<compile_context>
chip_gen: v6e
topology: v6e:2x2x1
jax: 0.10.0
libtpu: 0.0.40
codegen_flags: <defaults>
</compile_context>

<pallas_src>
import jax
import jax.numpy as jnp
from jax import lax
from jax.experimental import pallas as pl
from jax.experimental.pallas import tpu as pltpu


def _round_up(n, m):
    return ((n + m - 1) // m) * m


_UNROLL = 8  # time-step unroll / dense-store staging block (sublane tile)


def _fused_lstm_kernel(x_ref, wih_ref, whh_ref, b_ref, fcw_ref, fcb_ref,
                       out_ref, hseq_scr, gx_scr):
    """One grid step == one LSTM layer; last step also runs the FC head.

    x_ref    : (Tp, P)      zero-padded input sequence (same block every step)
    wih_ref  : (1, P, 4P)   this layer's input->gate weights (lane-aligned gates)
    whh_ref  : (1, P, 4P)   this layer's hidden->gate weights
    b_ref    : (1, 1, 4P)   this layer's folded bias (b_ih + b_hh), f32
    fcw_ref  : (1, P)       FC weight as a zero-padded row
    fcb_ref  : (1, 1)       FC bias
    out_ref  : (Tp, 128)    FC output broadcast across lanes (lane-dense store)
    hseq_scr : (Tp, P)      persistent VMEM: layer input, overwritten in-place
                            with the layer output (safe: Gx is precomputed)
    gx_scr   : (Tp, 4P)     persistent VMEM: batched input projection
    """
    layer = pl.program_id(0)
    n_layers = pl.num_programs(0)
    Tp, P = hseq_scr.shape
    U = _UNROLL
    mx_dtype = wih_ref.dtype  # f32 or bf16 matmul operands; accumulation is f32

    # Layer-0 input = padded x; stays resident in VMEM for the whole grid.
    @pl.when(layer == 0)
    def _():
        hseq_scr[...] = x_ref[...]

    # Hoisted x-path: one (Tp, P) x (P, 4P) MXU matmul for all timesteps
    # instead of Tp matmuls with M=1; bias (f32) folded in here.
    gx_scr[...] = (
        jnp.dot(hseq_scr[...].astype(mx_dtype), wih_ref[0],
                preferred_element_type=jnp.float32)
        + b_ref[0])

    def sigmoid1(v):  # one EUP op instead of exp + divide
        return 0.5 * jnp.tanh(0.5 * v) + 0.5

    def block_step(blk, carry):
        h_prev, c_prev = carry
        base = pl.multiple_of(blk * U, U)
        rows = []
        for u in range(U):  # short static unroll inside the sequential loop
            gates = gx_scr[pl.ds(base + u, 1), :] + jnp.dot(
                h_prev.astype(mx_dtype), whh_ref[0],
                preferred_element_type=jnp.float32)          # (1, 4P) f32
            # 128-lane-aligned gate slices -> whole-vreg VPU/EUP work.
            i_g = sigmoid1(gates[:, 0 * P:1 * P])
            f_g = sigmoid1(gates[:, 1 * P:2 * P])
            g_g = jnp.tanh(gates[:, 2 * P:3 * P])
            o_g = sigmoid1(gates[:, 3 * P:4 * P])
            c_prev = f_g * c_prev + i_g * g_g
            h_prev = o_g * jnp.tanh(c_prev)
            rows.append(h_prev)
        # One dense (U, P) store per block instead of U masked (1, P) stores.
        hseq_scr[pl.ds(base, U), :] = jnp.concatenate(rows, axis=0)
        return (h_prev, c_prev)

    h0 = jnp.zeros((1, P), jnp.float32)
    c0 = jnp.zeros((1, P), jnp.float32)
    lax.fori_loop(0, Tp // U, block_step, (h0, c0))

    # Fused FC head on the final layer only: VPU multiply + lane reduction
    # over the resident activations; lane-dense (Tp, 128) store.
    @pl.when(layer == n_layers - 1)
    def _():
        y = (jnp.sum(hseq_scr[...] * fcw_ref[...], axis=-1, keepdims=True)
             + fcb_ref[...])                                  # (Tp, 1)
        out_ref[...] = jnp.broadcast_to(y, out_ref.shape)


def init_params(key, input_size, hidden_size, num_layers):
    """PyTorch-style U(-1/sqrt(H), 1/sqrt(H)) init, gate order (i, f, g, o).

    Weights stored transposed: W_ih as (in, 4H), W_hh as (H, 4H)."""
    bound = 1.0 / jnp.sqrt(jnp.float32(hidden_size))
    params = {"layers": []}
    for l in range(num_layers):
        in_l = input_size if l == 0 else hidden_size
        key, k1, k2, k3, k4 = jax.random.split(key, 5)
        w_ih_t = jax.random.uniform(k1, (in_l, 4 * hidden_size),
                                    jnp.float32, -bound, bound)
        w_hh_t = jax.random.uniform(k2, (hidden_size, 4 * hidden_size),
                                    jnp.float32, -bound, bound)
        b_ih = jax.random.uniform(k3, (1, 4 * hidden_size),
                                  jnp.float32, -bound, bound)
        b_hh = jax.random.uniform(k4, (1, 4 * hidden_size),
                                  jnp.float32, -bound, bound)
        params["layers"].append((w_ih_t, w_hh_t, b_ih, b_hh))
    key, k5, k6 = jax.random.split(key, 3)
    params["fc_w_t"] = jax.random.uniform(k5, (hidden_size, 1),
                                          jnp.float32, -bound, bound)
    params["fc_b"] = jax.random.uniform(k6, (1, 1),
                                        jnp.float32, -bound, bound)
    return params


def pack_params(params, input_size, hidden_size, weight_dtype=jnp.float32):
    """Pad + stack weights into lane-aligned, layer-stacked kernel layouts.

    Gate g is placed at columns [g*P, g*P+H) (P = padded width) so every gate
    slice in the kernel starts on a 128-lane boundary; b_ih + b_hh is folded.
    weight_dtype=jnp.bfloat16 halves weight HBM/VMEM traffic on v6e/v7x
    (matmuls still accumulate in f32; gate math stays f32)."""
    H = hidden_size
    L = len(params["layers"])
    # NOTE: for H >= 256 on v6e/v7x, pad P to a multiple of 256 to fill the
    # 256-wide MXU contraction; 128 is fine for small/latency-bound shapes.
    P = _round_up(max(input_size, H), 128)

    w_ih_p = jnp.zeros((L, P, 4 * P), jnp.float32)
    w_hh_p = jnp.zeros((L, P, 4 * P), jnp.float32)
    b_p = jnp.zeros((L, 1, 4 * P), jnp.float32)
    for l, (w_ih_t, w_hh_t, b_ih, b_hh) in enumerate(params["layers"]):
        in_l = w_ih_t.shape[0]
        b = b_ih + b_hh
        for g in range(4):
            w_ih_p = w_ih_p.at[l, :in_l, g * P:g * P + H].set(
                w_ih_t[:, g * H:(g + 1) * H])
            w_hh_p = w_hh_p.at[l, :H, g * P:g * P + H].set(
                w_hh_t[:, g * H:(g + 1) * H])
            b_p = b_p.at[l, :, g * P:g * P + H].set(b[:, g * H:(g + 1) * H])

    fc_w_row = jnp.zeros((1, P), jnp.float32).at[0, :H].set(
        params["fc_w_t"][:, 0])
    return {"w_ih": w_ih_p.astype(weight_dtype),
            "w_hh": w_hh_p.astype(weight_dtype),
            "b": b_p,
            "fc_w": fc_w_row, "fc_b": params["fc_b"], "P": P}


def _vmem_bytes_estimate(Tp, P, w_itemsize):
    dbl = 2  # pallas double-buffers pipelined operands
    weights = dbl * (2 * P * 4 * P * w_itemsize + 4 * P * 4)   # W_ih + W_hh + bias
    scratch = Tp * P * 4 + Tp * 4 * P * 4                      # hseq + gx (f32)
    io = dbl * (Tp * P * 4 + Tp * 128 * 4 + P * 4 + 4)         # x, out, fc_w, fc_b
    return weights + scratch + io


def lstm_model_forward(packed, x):
    """x: (seq_len, input_size) -> (seq_len, 1). One pallas_call, grid=(L,)."""
    T, in_sz = x.shape
    P = packed["P"]
    L = packed["w_ih"].shape[0]
    Tp = _round_up(max(T, _UNROLL), _UNROLL)
    assert Tp % _UNROLL == 0
    x_pad = jnp.zeros((Tp, P), jnp.float32).at[:T, :in_sz].set(x)

    est = _vmem_bytes_estimate(Tp, P, packed["w_ih"].dtype.itemsize)
    vmem_limit = min(64 * 1024 * 1024, max(2 * est, 32 * 1024 * 1024))

    out_pad = pl.pallas_call(
        _fused_lstm_kernel,
        out_shape=jax.ShapeDtypeStruct((Tp, 128), jnp.float32),
        grid_spec=pltpu.PrefetchScalarGridSpec(
            num_scalar_prefetch=0,
            grid=(L,),
            in_specs=[
                pl.BlockSpec((Tp, P), lambda l: (0, 0)),            # x (same blk)
                pl.BlockSpec((1, P, 4 * P), lambda l: (l, 0, 0)),   # W_ih[l]
                pl.BlockSpec((1, P, 4 * P), lambda l: (l, 0, 0)),   # W_hh[l]
                pl.BlockSpec((1, 1, 4 * P), lambda l: (l, 0, 0)),   # bias[l]
                pl.BlockSpec((1, P), lambda l: (0, 0)),             # fc_w
                pl.BlockSpec((1, 1), lambda l: (0, 0)),             # fc_b
            ],
            out_specs=pl.BlockSpec((Tp, 128), lambda l: (0, 0)),
            scratch_shapes=[pltpu.VMEM((Tp, P), jnp.float32),       # hseq
                            pltpu.VMEM((Tp, 4 * P), jnp.float32)],  # gx
        ),
        compiler_params=pltpu.CompilerParams(
            dimension_semantics=("arbitrary",),
            vmem_limit_bytes=int(vmem_limit)),
    )(x_pad, packed["w_ih"], packed["w_hh"], packed["b"],
      packed["fc_w"], packed["fc_b"])
    return out_pad[:T, :1]


# ---------- pure-JAX reference for correctness ----------
def lstm_model_reference(params, x):
    h_seq = x
    for (w_ih_t, w_hh_t, b_ih, b_hh) in params["layers"]:
        H = w_hh_t.shape[0]
        h = jnp.zeros((1, H), jnp.float32)
        c = jnp.zeros((1, H), jnp.float32)
        outs = []
        for t in range(h_seq.shape[0]):
            g = h_seq[t:t + 1] @ w_ih_t + h @ w_hh_t + b_ih + b_hh
            i_g = jax.nn.sigmoid(g[:, 0:H])
            f_g = jax.nn.sigmoid(g[:, H:2 * H])
            g_g = jnp.tanh(g[:, 2 * H:3 * H])
            o_g = jax.nn.sigmoid(g[:, 3 * H:4 * H])
            c = f_g * c + i_g * g_g
            h = o_g * jnp.tanh(c)
            outs.append(h)
        h_seq = jnp.concatenate(outs, axis=0)
    return h_seq @ params["fc_w_t"] + params["fc_b"]


if __name__ == "__main__":
    seq_len = 8
    input_size = 16
    hidden_size = 32
    num_layers = 2

    key = jax.random.PRNGKey(0)
    key, xkey = jax.random.split(key)
    x = jax.random.normal(xkey, (seq_len, input_size), jnp.float32)

    params = init_params(key, input_size, hidden_size, num_layers)
    ref = lstm_model_reference(params, x)

    # f32 weights: bit-faithful path, tight tolerance.
    packed_f32 = pack_params(params, input_size, hidden_size,
                             weight_dtype=jnp.float32)
    out_f32 = jax.block_until_ready(lstm_model_forward(packed_f32, x))
    assert out_f32.shape == (seq_len, 1)
    assert jnp.allclose(out_f32, ref, atol=1e-4, rtol=1e-4)

    # bf16 weights (f32 accumulation): halved weight traffic on v6e/v7x.
    packed_bf16 = pack_params(params, input_size, hidden_size,
                              weight_dtype=jnp.bfloat16)
    out_bf16 = jax.block_until_ready(lstm_model_forward(packed_bf16, x))
    assert out_bf16.shape == (seq_len, 1)
    assert bool(jnp.all(jnp.isfinite(out_bf16)))
    assert jnp.allclose(out_bf16, ref, atol=1e-1, rtol=1e-1)

    print("KERNEL_OK")
</pallas_src>

<mosaic_0001>
module attributes {stable_mosaic.version = 11 : i64} {
  func.func @_fused_lstm_kernel(%arg0: i32, %arg1: memref<8x128xf32, #tpu.memory_space<vmem>>, %arg2: memref<1x128x512xf32, #tpu.memory_space<vmem>>, %arg3: memref<1x128x512xf32, #tpu.memory_space<vmem>>, %arg4: memref<1x1x512xf32, #tpu.memory_space<vmem>>, %arg5: memref<1x128xf32, #tpu.memory_space<vmem>>, %arg6: memref<1x1xf32, #tpu.memory_space<vmem>>, %arg7: memref<8x128xf32, #tpu.memory_space<vmem>>, %arg8: memref<8x128xf32, #tpu.memory_space<vmem>>, %arg9: memref<8x512xf32, #tpu.memory_space<vmem>>) attributes {dimension_semantics = [#tpu.dimension_semantics<arbitrary>], iteration_bounds = array<i64: 2>, scalar_prefetch = 0 : i64, scratch_operands = 2 : i64, tpu.core_type = #tpu.core_type<tc>, window_params = [{pipeline_mode = #tpu.pipeline_mode<synchronous>, transform_indices = @transform_0, window_bounds = array<i64: 8, 128>}, {transform_indices = @transform_1, window_bounds = array<i64: 1, 128, 512>}, {transform_indices = @transform_2, window_bounds = array<i64: 1, 128, 512>}, {transform_indices = @transform_3, window_bounds = array<i64: 1, 1, 512>}, {pipeline_mode = #tpu.pipeline_mode<synchronous>, transform_indices = @transform_4, window_bounds = array<i64: 1, 128>}, {pipeline_mode = #tpu.pipeline_mode<synchronous>, transform_indices = @transform_5, window_bounds = array<i64: 1, 1>}, {pipeline_mode = #tpu.pipeline_mode<synchronous>, transform_indices = @transform_6, window_bounds = array<i64: 8, 128>}]} {
    %c0_i32 = arith.constant 0 : i32
    %0 = arith.cmpi eq, %arg0, %c0_i32 : i32
    %1 = arith.extui %0 : i1 to i32
    %c0_i32_0 = arith.constant 0 : i32
    %2 = arith.cmpi ne, %1, %c0_i32_0 : i32
    scf.if %2 {
      %c0_130 = arith.constant 0 : index
      %c0_131 = arith.constant 0 : index
      %326 = vector.load %arg1[%c0_130, %c0_131] : memref<8x128xf32, #tpu.memory_space<vmem>>, vector<8x128xf32>
      %c0_132 = arith.constant 0 : index
      %c0_133 = arith.constant 0 : index
      %327 = vector.load %arg8[%c0_132, %c0_133] : memref<8x128xf32, #tpu.memory_space<vmem>>, vector<8x128xf32>
      tpu.vector_store %arg8[%c0_132, %c0_133], %326 {strides = array<i32>} : memref<8x128xf32, #tpu.memory_space<vmem>>, vector<8x128xf32>,
    } else {
    }
    %c0 = arith.constant 0 : index
    %c0_1 = arith.constant 0 : index
    %3 = vector.load %arg8[%c0, %c0_1] : memref<8x128xf32, #tpu.memory_space<vmem>>, vector<8x128xf32>
    %c0_2 = arith.constant 0 : index
    %c0_3 = arith.constant 0 : index
    %c0_4 = arith.constant 0 : index
    %4 = vector.load %arg2[%c0_2, %c0_3, %c0_4] : memref<1x128x512xf32, #tpu.memory_space<vmem>>, vector<1x128x512xf32>
    %5 = vector.shape_cast %4 : vector<1x128x512xf32> to vector<128x512xf32>
    %cst = arith.constant dense<0.000000e+00> : vector<8x512xf32>
    %6 = tpu.matmul %3, %5, %cst {dimension_numbers = #tpu.dot_dimension_numbers<[1], [0], [0], [1], [0, 0, 1, 1], [], []>} : vector<8x128xf32>, vector<128x512xf32>, vector<8x512xf32> -> vector<8x512xf32>
    %c0_5 = arith.constant 0 : index
    %c0_6 = arith.constant 0 : index
    %c0_7 = arith.constant 0 : index
    %7 = vector.load %arg4[%c0_5, %c0_6, %c0_7] : memref<1x1x512xf32, #tpu.memory_space<vmem>>, vector<1x1x512xf32>
    %8 = vector.shape_cast %7 : vector<1x1x512xf32> to vector<1x512xf32>
    %9 = vector.broadcast %8 : vector<1x512xf32> to vector<8x512xf32>
    %10 = arith.addf %6, %9 : vector<8x512xf32>
    %c0_8 = arith.constant 0 : index
    %c0_9 = arith.constant 0 : index
    %11 = vector.load %arg9[%c0_8, %c0_9] : memref<8x512xf32, #tpu.memory_space<vmem>>, vector<8x512xf32>
    tpu.vector_store %arg9[%c0_8, %c0_9], %10 {strides = array<i32>} : memref<8x512xf32, #tpu.memory_space<vmem>>, vector<8x512xf32>,
    %cst_10 = arith.constant 0.000000e+00 : f32
    %12 = vector.broadcast %cst_10 : f32 to vector<1x128xf32>
    %cst_11 = arith.constant 0.000000e+00 : f32
    %13 = vector.broadcast %cst_11 : f32 to vector<1x128xf32>
    %c0_i32_12 = arith.constant 0 : i32
    %c8_i32 = arith.constant 8 : i32
    %14 = arith.muli %c0_i32_12, %c8_i32 : i32
    %15 = tpu.assume_multiple %14, 8 : i32
    %c0_i32_13 = arith.constant 0 : i32
    %16 = arith.addi %15, %c0_i32_13 : i32
    %17 = arith.index_cast %16 : i32 to index
    %c0_14 = arith.constant 0 : index
    %18 = vector.load %arg9[%17, %c0_14] : memref<8x512xf32, #tpu.memory_space<vmem>>, vector<1x512xf32>
    %c0_15 = arith.constant 0 : index
    %c0_16 = arith.constant 0 : index
    %c0_17 = arith.constant 0 : index
    %19 = vector.load %arg3[%c0_15, %c0_16, %c0_17] : memref<1x128x512xf32, #tpu.memory_space<vmem>>, vector<1x128x512xf32>
    %20 = vector.shape_cast %19 : vector<1x128x512xf32> to vector<128x512xf32>
    %cst_18 = arith.constant dense<0.000000e+00> : vector<1x512xf32>
    %21 = tpu.matmul %12, %20, %cst_18 {dimension_numbers = #tpu.dot_dimension_numbers<[1], [0], [0], [1], [0, 0, 1, 1], [], []>} : vector<1x128xf32>, vector<128x512xf32>, vector<1x512xf32> -> vector<1x512xf32>
    %22 = arith.addf %18, %21 : vector<1x512xf32>
    %23 = vector.extract_strided_slice %22 {offsets = [0, 0], sizes = [1, 128], strides = [1, 1]} : vector<1x512xf32> to vector<1x128xf32>
    %cst_19 = arith.constant 5.000000e-01 : f32
    %24 = vector.broadcast %cst_19 : f32 to vector<1x128xf32>
    %25 = arith.mulf %24, %23 : vector<1x128xf32>
    %26 = math.tanh %25 : vector<1x128xf32>
    %cst_20 = arith.constant 5.000000e-01 : f32
    %27 = vector.broadcast %cst_20 : f32 to vector<1x128xf32>
    %28 = arith.mulf %27, %26 : vector<1x128xf32>
    %cst_21 = arith.constant 5.000000e-01 : f32
    %29 = vector.broadcast %cst_21 : f32 to vector<1x128xf32>
    %30 = arith.addf %28, %29 : vector<1x128xf32>
    %31 = vector.extract_strided_slice %22 {offsets = [0, 128], sizes = [1, 128], strides = [1, 1]} : vector<1x512xf32> to vector<1x128xf32>
    %cst_22 = arith.constant 5.000000e-01 : f32
    %32 = vector.broadcast %cst_22 : f32 to vector<1x128xf32>
    %33 = arith.mulf %32, %31 : vector<1x128xf32>
    %34 = math.tanh %33 : vector<1x128xf32>
    %cst_23 = arith.constant 5.000000e-01 : f32
    %35 = vector.broadcast %cst_23 : f32 to vector<1x128xf32>
    %36 = arith.mulf %35, %34 : vector<1x128xf32>
    %cst_24 = arith.constant 5.000000e-01 : f32
    %37 = vector.broadcast %cst_24 : f32 to vector<1x128xf32>
    %38 = arith.addf %36, %37 : vector<1x128xf32>
    %39 = vector.extract_strided_slice %22 {offsets = [0, 256], sizes = [1, 128], strides = [1, 1]} : vector<1x512xf32> to vector<1x128xf32>
    %40 = math.tanh %39 : vector<1x128xf32>
    %41 = vector.extract_strided_slice %22 {offsets = [0, 384], sizes = [1, 128], strides = [1, 1]} : vector<1x512xf32> to vector<1x128xf32>
    %cst_25 = arith.constant 5.000000e-01 : f32
    %42 = vector.broadcast %cst_25 : f32 to vector<1x128xf32>
    %43 = arith.mulf %42, %41 : vector<1x128xf32>
    %44 = math.tanh %43 : vector<1x128xf32>
    %cst_26 = arith.constant 5.000000e-01 : f32
    %45 = vector.broadcast %cst_26 : f32 to vector<1x128xf32>
    %46 = arith.mulf %45, %44 : vector<1x128xf32>
    %cst_27 = arith.constant 5.000000e-01 : f32
    %47 = vector.broadcast %cst_27 : f32 to vector<1x128xf32>
    %48 = arith.addf %46, %47 : vector<1x128xf32>
    %49 = arith.mulf %38, %13 : vector<1x128xf32>
    %50 = arith.mulf %30, %40 : vector<1x128xf32>
    %51 = arith.addf %49, %50 : vector<1x128xf32>
    %52 = math.tanh %51 : vector<1x128xf32>
    %53 = arith.mulf %48, %52 : vector<1x128xf32>
    %c1_i32 = arith.constant 1 : i32
    %54 = arith.addi %15, %c1_i32 : i32
    %55 = arith.index_cast %54 : i32 to index
    %c0_28 = arith.constant 0 : index
    %56 = vector.load %arg9[%55, %c0_28] : memref<8x512xf32, #tpu.memory_space<vmem>>, vector<1x512xf32>
    %c0_29 = arith.constant 0 : index
    %c0_30 = arith.constant 0 : index
    %c0_31 = arith.constant 0 : index
    %57 = vector.load %arg3[%c0_29, %c0_30, %c0_31] : memref<1x128x512xf32, #tpu.memory_space<vmem>>, vector<1x128x512xf32>
    %58 = vector.shape_cast %57 : vector<1x128x512xf32> to vector<128x512xf32>
    %cst_32 = arith.constant dense<0.000000e+00> : vector<1x512xf32>
    %59 = tpu.matmul %53, %58, %cst_32 {dimension_numbers = #tpu.dot_dimension_numbers<[1], [0], [0], [1], [0, 0, 1, 1], [], []>} : vector<1x128xf32>, vector<128x512xf32>, vector<1x512xf32> -> vector<1x512xf32>
    %60 = arith.addf %56, %59 : vector<1x512xf32>
    %61 = vector.extract_strided_slice %60 {offsets = [0, 0], sizes = [1, 128], strides = [1, 1]} : vector<1x512xf32> to vector<1x128xf32>
    %cst_33 = arith.constant 5.000000e-01 : f32
    %62 = vector.broadcast %cst_33 : f32 to vector<1x128xf32>
    %63 = arith.mulf %62, %61 : vector<1x128xf32>
    %64 = math.tanh %63 : vector<1x128xf32>
    %cst_34 = arith.constant 5.000000e-01 : f32
    %65 = vector.broadcast %cst_34 : f32 to vector<1x128xf32>
    %66 = arith.mulf %65, %64 : vector<1x128xf32>
    %cst_35 = arith.constant 5.000000e-01 : f32
    %67 = vector.broadcast %cst_35 : f32 to vector<1x128xf32>
    %68 = arith.addf %66, %67 : vector<1x128xf32>
    %69 = vector.extract_strided_slice %60 {offsets = [0, 128], sizes = [1, 128], strides = [1, 1]} : vector<1x512xf32> to vector<1x128xf32>
    %cst_36 = arith.constant 5.000000e-01 : f32
    %70 = vector.broadcast %cst_36 : f32 to vector<1x128xf32>
    %71 = arith.mulf %70, %69 : vector<1x128xf32>
    %72 = math.tanh %71 : vector<1x128xf32>
    %cst_37 = arith.constant 5.000000e-01 : f32
    %73 = vector.broadcast %cst_37 : f32 to vector<1x128xf32>
    %74 = arith.mulf %73, %72 : vector<1x128xf32>
    %cst_38 = arith.constant 5.000000e-01 : f32
    %75 = vector.broadcast %cst_38 : f32 to vector<1x128xf32>
    %76 = arith.addf %74, %75 : vector<1x128xf32>
    %77 = vector.extract_strided_slice %60 {offsets = [0, 256], sizes = [1, 128], strides = [1, 1]} : vector<1x512xf32> to vector<1x128xf32>
    %78 = math.tanh %77 : vector<1x128xf32>
    %79 = vector.extract_strided_slice %60 {offsets = [0, 384], sizes = [1, 128], strides = [1, 1]} : vector<1x512xf32> to vector<1x128xf32>
    %cst_39 = arith.constant 5.000000e-01 : f32
    %80 = vector.broadcast %cst_39 : f32 to vector<1x128xf32>
    %81 = arith.mulf %80, %79 : vector<1x128xf32>
    %82 = math.tanh %81 : vector<1x128xf32>
    %cst_40 = arith.constant 5.000000e-01 : f32
    %83 = vector.broadcast %cst_40 : f32 to vector<1x128xf32>
    %84 = arith.mulf %83, %82 : vector<1x128xf32>
    %cst_41 = arith.constant 5.000000e-01 : f32
    %85 = vector.broadcast %cst_41 : f32 to vector<1x128xf32>
    %86 = arith.addf %84, %85 : vector<1x128xf32>
    %87 = arith.mulf %76, %51 : vector<1x128xf32>
    %88 = arith.mulf %68, %78 : vector<1x128xf32>
    %89 = arith.addf %87, %88 : vector<1x128xf32>
    %90 = math.tanh %89 : vector<1x128xf32>
    %91 = arith.mulf %86, %90 : vector<1x128xf32>
    %c2_i32 = arith.constant 2 : i32
    %92 = arith.addi %15, %c2_i32 : i32
    %93 = arith.index_cast %92 : i32 to index
    %c0_42 = arith.constant 0 : index
    %94 = vector.load %arg9[%93, %c0_42] : memref<8x512xf32, #tpu.memory_space<vmem>>, vector<1x512xf32>
    %c0_43 = arith.constant 0 : index
    %c0_44 = arith.constant 0 : index
    %c0_45 = arith.constant 0 : index
    %95 = vector.load %arg3[%c0_43, %c0_44, %c0_45] : memref<1x128x512xf32, #tpu.memory_space<vmem>>, vector<1x128x512xf32>
    %96 = vector.shape_cast %95 : vector<1x128x512xf32> to vector<128x512xf32>
    %cst_46 = arith.constant dense<0.000000e+00> : vector<1x512xf32>
    %97 = tpu.matmul %91, %96, %cst_46 {dimension_numbers = #tpu.dot_dimension_numbers<[1], [0], [0], [1], [0, 0, 1, 1], [], []>} : vector<1x128xf32>, vector<128x512xf32>, vector<1x512xf32> -> vector<1x512xf32>
    %98 = arith.addf %94, %97 : vector<1x512xf32>
    %99 = vector.extract_strided_slice %98 {offsets = [0, 0], sizes = [1, 128], strides = [1, 1]} : vector<1x512xf32> to vector<1x128xf32>
    %cst_47 = arith.constant 5.000000e-01 : f32
    %100 = vector.broadcast %cst_47 : f32 to vector<1x128xf32>
    %101 = arith.mulf %100, %99 : vector<1x128xf32>
    %102 = math.tanh %101 : vector<1x128xf32>
    %cst_48 = arith.constant 5.000000e-01 : f32
    %103 = vector.broadcast %cst_48 : f32 to vector<1x128xf32>
    %104 = arith.mulf %103, %102 : vector<1x128xf32>
    %cst_49 = arith.constant 5.000000e-01 : f32
    %105 = vector.broadcast %cst_49 : f32 to vector<1x128xf32>
    %106 = arith.addf %104, %105 : vector<1x128xf32>
    %107 = vector.extract_strided_slice %98 {offsets = [0, 128], sizes = [1, 128], strides = [1, 1]} : vector<1x512xf32> to vector<1x128xf32>
    %cst_50 = arith.constant 5.000000e-01 : f32
    %108 = vector.broadcast %cst_50 : f32 to vector<1x128xf32>
    %109 = arith.mulf %108, %107 : vector<1x128xf32>
    %110 = math.tanh %109 : vector<1x128xf32>
    %cst_51 = arith.constant 5.000000e-01 : f32
    %111 = vector.broadcast %cst_51 : f32 to vector<1x128xf32>
    %112 = arith.mulf %111, %110 : vector<1x128xf32>
    %cst_52 = arith.constant 5.000000e-01 : f32
    %113 = vector.broadcast %cst_52 : f32 to vector<1x128xf32>
    %114 = arith.addf %112, %113 : vector<1x128xf32>
    %115 = vector.extract_strided_slice %98 {offsets = [0, 256], sizes = [1, 128], strides = [1, 1]} : vector<1x512xf32> to vector<1x128xf32>
    %116 = math.tanh %115 : vector<1x128xf32>
    %117 = vector.extract_strided_slice %98 {offsets = [0, 384], sizes = [1, 128], strides = [1, 1]} : vector<1x512xf32> to vector<1x128xf32>
    %cst_53 = arith.constant 5.000000e-01 : f32
    %118 = vector.broadcast %cst_53 : f32 to vector<1x128xf32>
    %119 = arith.mulf %118, %117 : vector<1x128xf32>
    %120 = math.tanh %119 : vector<1x128xf32>
    %cst_54 = arith.constant 5.000000e-01 : f32
    %121 = vector.broadcast %cst_54 : f32 to vector<1x128xf32>
    %122 = arith.mulf %121, %120 : vector<1x128xf32>
    %cst_55 = arith.constant 5.000000e-01 : f32
    %123 = vector.broadcast %cst_55 : f32 to vector<1x128xf32>
    %124 = arith.addf %122, %123 : vector<1x128xf32>
    %125 = arith.mulf %114, %89 : vector<1x128xf32>
    %126 = arith.mulf %106, %116 : vector<1x128xf32>
    %127 = arith.addf %125, %126 : vector<1x128xf32>
    %128 = math.tanh %127 : vector<1x128xf32>
    %129 = arith.mulf %124, %128 : vector<1x128xf32>
    %c3_i32 = arith.constant 3 : i32
    %130 = arith.addi %15, %c3_i32 : i32
    %131 = arith.index_cast %130 : i32 to index
    %c0_56 = arith.constant 0 : index
    %132 = vector.load %arg9[%131, %c0_56] : memref<8x512xf32, #tpu.memory_space<vmem>>, vector<1x512xf32>
    %c0_57 = arith.constant 0 : index
    %c0_58 = arith.constant 0 : index
    %c0_59 = arith.constant 0 : index
    %133 = vector.load %arg3[%c0_57, %c0_58, %c0_59] : memref<1x128x512xf32, #tpu.memory_space<vmem>>, vector<1x128x512xf32>
    %134 = vector.shape_cast %133 : vector<1x128x512xf32> to vector<128x512xf32>
    %cst_60 = arith.constant dense<0.000000e+00> : vector<1x512xf32>
    %135 = tpu.matmul %129, %134, %cst_60 {dimension_numbers = #tpu.dot_dimension_numbers<[1], [0], [0], [1], [0, 0, 1, 1], [], []>} : vector<1x128xf32>, vector<128x512xf32>, vector<1x512xf32> -> vector<1x512xf32>
    %136 = arith.addf %132, %135 : vector<1x512xf32>
    %137 = vector.extract_strided_slice %136 {offsets = [0, 0], sizes = [1, 128], strides = [1, 1]} : vector<1x512xf32> to vector<1x128xf32>
    %cst_61 = arith.constant 5.000000e-01 : f32
    %138 = vector.broadcast %cst_61 : f32 to vector<1x128xf32>
    %139 = arith.mulf %138, %137 : vector<1x128xf32>
    %140 = math.tanh %139 : vector<1x128xf32>
    %cst_62 = arith.constant 5.000000e-01 : f32
    %141 = vector.broadcast %cst_62 : f32 to vector<1x128xf32>
    %142 = arith.mulf %141, %140 : vector<1x128xf32>
    %cst_63 = arith.constant 5.000000e-01 : f32
    %143 = vector.broadcast %cst_63 : f32 to vector<1x128xf32>
    %144 = arith.addf %142, %143 : vector<1x128xf32>
    %145 = vector.extract_strided_slice %136 {offsets = [0, 128], sizes = [1, 128], strides = [1, 1]} : vector<1x512xf32> to vector<1x128xf32>
    %cst_64 = arith.constant 5.000000e-01 : f32
    %146 = vector.broadcast %cst_64 : f32 to vector<1x128xf32>
    %147 = arith.mulf %146, %145 : vector<1x128xf32>
    %148 = math.tanh %147 : vector<1x128xf32>
    %cst_65 = arith.constant 5.000000e-01 : f32
    %149 = vector.broadcast %cst_65 : f32 to vector<1x128xf32>
    %150 = arith.mulf %149, %148 : vector<1x128xf32>
    %cst_66 = arith.constant 5.000000e-01 : f32
    %151 = vector.broadcast %cst_66 : f32 to vector<1x128xf32>
    %152 = arith.addf %150, %151 : vector<1x128xf32>
    %153 = vector.extract_strided_slice %136 {offsets = [0, 256], sizes = [1, 128], strides = [1, 1]} : vector<1x512xf32> to vector<1x128xf32>
    %154 = math.tanh %153 : vector<1x128xf32>
    %155 = vector.extract_strided_slice %136 {offsets = [0, 384], sizes = [1, 128], strides = [1, 1]} : vector<1x512xf32> to vector<1x128xf32>
    %cst_67 = arith.constant 5.000000e-01 : f32
    %156 = vector.broadcast %cst_67 : f32 to vector<1x128xf32>
    %157 = arith.mulf %156, %155 : vector<1x128xf32>
    %158 = math.tanh %157 : vector<1x128xf32>
    %cst_68 = arith.constant 5.000000e-01 : f32
    %159 = vector.broadcast %cst_68 : f32 to vector<1x128xf32>
    %160 = arith.mulf %159, %158 : vector<1x128xf32>
    %cst_69 = arith.constant 5.000000e-01 : f32
    %161 = vector.broadcast %cst_69 : f32 to vector<1x128xf32>
    %162 = arith.addf %160, %161 : vector<1x128xf32>
    %163 = arith.mulf %152, %127 : vector<1x128xf32>
    %164 = arith.mulf %144, %154 : vector<1x128xf32>
    %165 = arith.addf %163, %164 : vector<1x128xf32>
    %166 = math.tanh %165 : vector<1x128xf32>
    %167 = arith.mulf %162, %166 : vector<1x128xf32>
    %c4_i32 = arith.constant 4 : i32
    %168 = arith.addi %15, %c4_i32 : i32
    %169 = arith.index_cast %168 : i32 to index
    %c0_70 = arith.constant 0 : index
    %170 = vector.load %arg9[%169, %c0_70] : memref<8x512xf32, #tpu.memory_space<vmem>>, vector<1x512xf32>
    %c0_71 = arith.constant 0 : index
    %c0_72 = arith.constant 0 : index
    %c0_73 = arith.constant 0 : index
    %171 = vector.load %arg3[%c0_71, %c0_72, %c0_73] : memref<1x128x512xf32, #tpu.memory_space<vmem>>, vector<1x128x512xf32>
    %172 = vector.shape_cast %171 : vector<1x128x512xf32> to vector<128x512xf32>
    %cst_74 = arith.constant dense<0.000000e+00> : vector<1x512xf32>
    %173 = tpu.matmul %167, %172, %cst_74 {dimension_numbers = #tpu.dot_dimension_numbers<[1], [0], [0], [1], [0, 0, 1, 1], [], []>} : vector<1x128xf32>, vector<128x512xf32>, vector<1x512xf32> -> vector<1x512xf32>
    %174 = arith.addf %170, %173 : vector<1x512xf32>
    %175 = vector.extract_strided_slice %174 {offsets = [0, 0], sizes = [1, 128], strides = [1, 1]} : vector<1x512xf32> to vector<1x128xf32>
    %cst_75 = arith.constant 5.000000e-01 : f32
    %176 = vector.broadcast %cst_75 : f32 to vector<1x128xf32>
    %177 = arith.mulf %176, %175 : vector<1x128xf32>
    %178 = math.tanh %177 : vector<1x128xf32>
    %cst_76 = arith.constant 5.000000e-01 : f32
    %179 = vector.broadcast %cst_76 : f32 to vector<1x128xf32>
    %180 = arith.mulf %179, %178 : vector<1x128xf32>
    %cst_77 = arith.constant 5.000000e-01 : f32
    %181 = vector.broadcast %cst_77 : f32 to vector<1x128xf32>
    %182 = arith.addf %180, %181 : vector<1x128xf32>
    %183 = vector.extract_strided_slice %174 {offsets = [0, 128], sizes = [1, 128], strides = [1, 1]} : vector<1x512xf32> to vector<1x128xf32>
    %cst_78 = arith.constant 5.000000e-01 : f32
    %184 = vector.broadcast %cst_78 : f32 to vector<1x128xf32>
    %185 = arith.mulf %184, %183 : vector<1x128xf32>
    %186 = math.tanh %185 : vector<1x128xf32>
    %cst_79 = arith.constant 5.000000e-01 : f32
    %187 = vector.broadcast %cst_79 : f32 to vector<1x128xf32>
    %188 = arith.mulf %187, %186 : vector<1x128xf32>
    %cst_80 = arith.constant 5.000000e-01 : f32
    %189 = vector.broadcast %cst_80 : f32 to vector<1x128xf32>
    %190 = arith.addf %188, %189 : vector<1x128xf32>
    %191 = vector.extract_strided_slice %174 {offsets = [0, 256], sizes = [1, 128], strides = [1, 1]} : vector<1x512xf32> to vector<1x128xf32>
    %192 = math.tanh %191 : vector<1x128xf32>
    %193 = vector.extract_strided_slice %174 {offsets = [0, 384], sizes = [1, 128], strides = [1, 1]} : vector<1x512xf32> to vector<1x128xf32>
    %cst_81 = arith.constant 5.000000e-01 : f32
    %194 = vector.broadcast %cst_81 : f32 to vector<1x128xf32>
    %195 = arith.mulf %194, %193 : vector<1x128xf32>
    %196 = math.tanh %195 : vector<1x128xf32>
    %cst_82 = arith.constant 5.000000e-01 : f32
    %197 = vector.broadcast %cst_82 : f32 to vector<1x128xf32>
    %198 = arith.mulf %197, %196 : vector<1x128xf32>
    %cst_83 = arith.constant 5.000000e-01 : f32
    %199 = vector.broadcast %cst_83 : f32 to vector<1x128xf32>
    %200 = arith.addf %198, %199 : vector<1x128xf32>
    %201 = arith.mulf %190, %165 : vector<1x128xf32>
    %202 = arith.mulf %182, %192 : vector<1x128xf32>
    %203 = arith.addf %201, %202 : vector<1x128xf32>
    %204 = math.tanh %203 : vector<1x128xf32>
    %205 = arith.mulf %200, %204 : vector<1x128xf32>
    %c5_i32 = arith.constant 5 : i32
    %206 = arith.addi %15, %c5_i32 : i32
    %207 = arith.index_cast %206 : i32 to index
    %c0_84 = arith.constant 0 : index
    %208 = vector.load %arg9[%207, %c0_84] : memref<8x512xf32, #tpu.memory_space<vmem>>, vector<1x512xf32>
    %c0_85 = arith.constant 0 : index
    %c0_86 = arith.constant 0 : index
    %c0_87 = arith.constant 0 : index
    %209 = vector.load %arg3[%c0_85, %c0_86, %c0_87] : memref<1x128x512xf32, #tpu.memory_space<vmem>>, vector<1x128x512xf32>
    %210 = vector.shape_cast %209 : vector<1x128x512xf32> to vector<128x512xf32>
    %cst_88 = arith.constant dense<0.000000e+00> : vector<1x512xf32>
    %211 = tpu.matmul %205, %210, %cst_88 {dimension_numbers = #tpu.dot_dimension_numbers<[1], [0], [0], [1], [0, 0, 1, 1], [], []>} : vector<1x128xf32>, vector<128x512xf32>, vector<1x512xf32> -> vector<1x512xf32>
    %212 = arith.addf %208, %211 : vector<1x512xf32>
    %213 = vector.extract_strided_slice %212 {offsets = [0, 0], sizes = [1, 128], strides = [1, 1]} : vector<1x512xf32> to vector<1x128xf32>
    %cst_89 = arith.constant 5.000000e-01 : f32
    %214 = vector.broadcast %cst_89 : f32 to vector<1x128xf32>
    %215 = arith.mulf %214, %213 : vector<1x128xf32>
    %216 = math.tanh %215 : vector<1x128xf32>
    %cst_90 = arith.constant 5.000000e-01 : f32
    %217 = vector.broadcast %cst_90 : f32 to vector<1x128xf32>
    %218 = arith.mulf %217, %216 : vector<1x128xf32>
    %cst_91 = arith.constant 5.000000e-01 : f32
    %219 = vector.broadcast %cst_91 : f32 to vector<1x128xf32>
    %220 = arith.addf %218, %219 : vector<1x128xf32>
    %221 = vector.extract_strided_slice %212 {offsets = [0, 128], sizes = [1, 128], strides = [1, 1]} : vector<1x512xf32> to vector<1x128xf32>
    %cst_92 = arith.constant 5.000000e-01 : f32
    %222 = vector.broadcast %cst_92 : f32 to vector<1x128xf32>
    %223 = arith.mulf %222, %221 : vector<1x128xf32>
    %224 = math.tanh %223 : vector<1x128xf32>
    %cst_93 = arith.constant 5.000000e-01 : f32
    %225 = vector.broadcast %cst_93 : f32 to vector<1x128xf32>
    %226 = arith.mulf %225, %224 : vector<1x128xf32>
    %cst_94 = arith.constant 5.000000e-01 : f32
    %227 = vector.broadcast %cst_94 : f32 to vector<1x128xf32>
    %228 = arith.addf %226, %227 : vector<1x128xf32>
    %229 = vector.extract_strided_slice %212 {offsets = [0, 256], sizes = [1, 128], strides = [1, 1]} : vector<1x512xf32> to vector<1x128xf32>
    %230 = math.tanh %229 : vector<1x128xf32>
    %231 = vector.extract_strided_slice %212 {offsets = [0, 384], sizes = [1, 128], strides = [1, 1]} : vector<1x512xf32> to vector<1x128xf32>
    %cst_95 = arith.constant 5.000000e-01 : f32
    %232 = vector.broadcast %cst_95 : f32 to vector<1x128xf32>
    %233 = arith.mulf %232, %231 : vector<1x128xf32>
    %234 = math.tanh %233 : vector<1x128xf32>
    %cst_96 = arith.constant 5.000000e-01 : f32
    %235 = vector.broadcast %cst_96 : f32 to vector<1x128xf32>
    %236 = arith.mulf %235, %234 : vector<1x128xf32>
    %cst_97 = arith.constant 5.000000e-01 : f32
    %237 = vector.broadcast %cst_97 : f32 to vector<1x128xf32>
    %238 = arith.addf %236, %237 : vector<1x128xf32>
    %239 = arith.mulf %228, %203 : vector<1x128xf32>
    %240 = arith.mulf %220, %230 : vector<1x128xf32>
    %241 = arith.addf %239, %240 : vector<1x128xf32>
    %242 = math.tanh %241 : vector<1x128xf32>
    %243 = arith.mulf %238, %242 : vector<1x128xf32>
    %c6_i32 = arith.constant 6 : i32
    %244 = arith.addi %15, %c6_i32 : i32
    %245 = arith.index_cast %244 : i32 to index
    %c0_98 = arith.constant 0 : index
    %246 = vector.load %arg9[%245, %c0_98] : memref<8x512xf32, #tpu.memory_space<vmem>>, vector<1x512xf32>
    %c0_99 = arith.constant 0 : index
    %c0_100 = arith.constant 0 : index
    %c0_101 = arith.constant 0 : index
    %247 = vector.load %arg3[%c0_99, %c0_100, %c0_101] : memref<1x128x512xf32, #tpu.memory_space<vmem>>, vector<1x128x512xf32>
    %248 = vector.shape_cast %247 : vector<1x128x512xf32> to vector<128x512xf32>
    %cst_102 = arith.constant dense<0.000000e+00> : vector<1x512xf32>
    %249 = tpu.matmul %243, %248, %cst_102 {dimension_numbers = #tpu.dot_dimension_numbers<[1], [0], [0], [1], [0, 0, 1, 1], [], []>} : vector<1x128xf32>, vector<128x512xf32>, vector<1x512xf32> -> vector<1x512xf32>
    %250 = arith.addf %246, %249 : vector<1x512xf32>
    %251 = vector.extract_strided_slice %250 {offsets = [0, 0], sizes = [1, 128], strides = [1, 1]} : vector<1x512xf32> to vector<1x128xf32>
    %cst_103 = arith.constant 5.000000e-01 : f32
    %252 = vector.broadcast %cst_103 : f32 to vector<1x128xf32>
    %253 = arith.mulf %252, %251 : vector<1x128xf32>
    %254 = math.tanh %253 : vector<1x128xf32>
    %cst_104 = arith.constant 5.000000e-01 : f32
    %255 = vector.broadcast %cst_104 : f32 to vector<1x128xf32>
    %256 = arith.mulf %255, %254 : vector<1x128xf32>
    %cst_105 = arith.constant 5.000000e-01 : f32
    %257 = vector.broadcast %cst_105 : f32 to vector<1x128xf32>
    %258 = arith.addf %256, %257 : vector<1x128xf32>
    %259 = vector.extract_strided_slice %250 {offsets = [0, 128], sizes = [1, 128], strides = [1, 1]} : vector<1x512xf32> to vector<1x128xf32>
    %cst_106 = arith.constant 5.000000e-01 : f32
    %260 = vector.broadcast %cst_106 : f32 to vector<1x128xf32>
    %261 = arith.mulf %260, %259 : vector<1x128xf32>
    %262 = math.tanh %261 : vector<1x128xf32>
    %cst_107 = arith.constant 5.000000e-01 : f32
    %263 = vector.broadcast %cst_107 : f32 to vector<1x128xf32>
    %264 = arith.mulf %263, %262 : vector<1x128xf32>
    %cst_108 = arith.constant 5.000000e-01 : f32
    %265 = vector.broadcast %cst_108 : f32 to vector<1x128xf32>
    %266 = arith.addf %264, %265 : vector<1x128xf32>
    %267 = vector.extract_strided_slice %250 {offsets = [0, 256], sizes = [1, 128], strides = [1, 1]} : vector<1x512xf32> to vector<1x128xf32>
    %268 = math.tanh %267 : vector<1x128xf32>
    %269 = vector.extract_strided_slice %250 {offsets = [0, 384], sizes = [1, 128], strides = [1, 1]} : vector<1x512xf32> to vector<1x128xf32>
    %cst_109 = arith.constant 5.000000e-01 : f32
    %270 = vector.broadcast %cst_109 : f32 to vector<1x128xf32>
    %271 = arith.mulf %270, %269 : vector<1x128xf32>
    %272 = math.tanh %271 : vector<1x128xf32>
    %cst_110 = arith.constant 5.000000e-01 : f32
    %273 = vector.broadcast %cst_110 : f32 to vector<1x128xf32>
    %274 = arith.mulf %273, %272 : vector<1x128xf32>
    %cst_111 = arith.constant 5.000000e-01 : f32
    %275 = vector.broadcast %cst_111 : f32 to vector<1x128xf32>
    %276 = arith.addf %274, %275 : vector<1x128xf32>
    %277 = arith.mulf %266, %241 : vector<1x128xf32>
    %278 = arith.mulf %258, %268 : vector<1x128xf32>
    %279 = arith.addf %277, %278 : vector<1x128xf32>
    %280 = math.tanh %279 : vector<1x128xf32>
    %281 = arith.mulf %276, %280 : vector<1x128xf32>
    %c7_i32 = arith.constant 7 : i32
    %282 = arith.addi %15, %c7_i32 : i32
    %283 = arith.index_cast %282 : i32 to index
    %c0_112 = arith.constant 0 : index
    %284 = vector.load %arg9[%283, %c0_112] : memref<8x512xf32, #tpu.memory_space<vmem>>, vector<1x512xf32>
    %c0_113 = arith.constant 0 : index
    %c0_114 = arith.constant 0 : index
    %c0_115 = arith.constant 0 : index
    %285 = vector.load %arg3[%c0_113, %c0_114, %c0_115] : memref<1x128x512xf32, #tpu.memory_space<vmem>>, vector<1x128x512xf32>
    %286 = vector.shape_cast %285 : vector<1x128x512xf32> to vector<128x512xf32>
    %cst_116 = arith.constant dense<0.000000e+00> : vector<1x512xf32>
    %287 = tpu.matmul %281, %286, %cst_116 {dimension_numbers = #tpu.dot_dimension_numbers<[1], [0], [0], [1], [0, 0, 1, 1], [], []>} : vector<1x128xf32>, vector<128x512xf32>, vector<1x512xf32> -> vector<1x512xf32>
    %288 = arith.addf %284, %287 : vector<1x512xf32>
    %289 = vector.extract_strided_slice %288 {offsets = [0, 0], sizes = [1, 128], strides = [1, 1]} : vector<1x512xf32> to vector<1x128xf32>
    %cst_117 = arith.constant 5.000000e-01 : f32
    %290 = vector.broadcast %cst_117 : f32 to vector<1x128xf32>
    %291 = arith.mulf %290, %289 : vector<1x128xf32>
    %292 = math.tanh %291 : vector<1x128xf32>
    %cst_118 = arith.constant 5.000000e-01 : f32
    %293 = vector.broadcast %cst_118 : f32 to vector<1x128xf32>
    %294 = arith.mulf %293, %292 : vector<1x128xf32>
    %cst_119 = arith.constant 5.000000e-01 : f32
    %295 = vector.broadcast %cst_119 : f32 to vector<1x128xf32>
    %296 = arith.addf %294, %295 : vector<1x128xf32>
    %297 = vector.extract_strided_slice %288 {offsets = [0, 128], sizes = [1, 128], strides = [1, 1]} : vector<1x512xf32> to vector<1x128xf32>
    %cst_120 = arith.constant 5.000000e-01 : f32
    %298 = vector.broadcast %cst_120 : f32 to vector<1x128xf32>
    %299 = arith.mulf %298, %297 : vector<1x128xf32>
    %300 = math.tanh %299 : vector<1x128xf32>
    %cst_121 = arith.constant 5.000000e-01 : f32
    %301 = vector.broadcast %cst_121 : f32 to vector<1x128xf32>
    %302 = arith.mulf %301, %300 : vector<1x128xf32>
    %cst_122 = arith.constant 5.000000e-01 : f32
    %303 = vector.broadcast %cst_122 : f32 to vector<1x128xf32>
    %304 = arith.addf %302, %303 : vector<1x128xf32>
    %305 = vector.extract_strided_slice %288 {offsets = [0, 256], sizes = [1, 128], strides = [1, 1]} : vector<1x512xf32> to vector<1x128xf32>
    %306 = math.tanh %305 : vector<1x128xf32>
    %307 = vector.extract_strided_slice %288 {offsets = [0, 384], sizes = [1, 128], strides = [1, 1]} : vector<1x512xf32> to vector<1x128xf32>
    %cst_123 = arith.constant 5.000000e-01 : f32
    %308 = vector.broadcast %cst_123 : f32 to vector<1x128xf32>
    %309 = arith.mulf %308, %307 : vector<1x128xf32>
    %310 = math.tanh %309 : vector<1x128xf32>
    %cst_124 = arith.constant 5.000000e-01 : f32
    %311 = vector.broadcast %cst_124 : f32 to vector<1x128xf32>
    %312 = arith.mulf %311, %310 : vector<1x128xf32>
    %cst_125 = arith.constant 5.000000e-01 : f32
    %313 = vector.broadcast %cst_125 : f32 to vector<1x128xf32>
    %314 = arith.addf %312, %313 : vector<1x128xf32>
    %315 = arith.mulf %304, %279 : vector<1x128xf32>
    %316 = arith.mulf %296, %306 : vector<1x128xf32>
    %317 = arith.addf %315, %316 : vector<1x128xf32>
    %318 = math.tanh %317 : vector<1x128xf32>
    %319 = arith.mulf %314, %318 : vector<1x128xf32>
    %320 = tpu.concatenate %53, %91, %129, %167, %205, %243, %281, %319 in 0 : vector<1x128xf32>, vector<1x128xf32>, vector<1x128xf32>, vector<1x128xf32>, vector<1x128xf32>, vector<1x128xf32>, vector<1x128xf32>, vector<1x128xf32> -> vector<8x128xf32>
    %321 = arith.index_cast %15 : i32 to index
    %c0_126 = arith.constant 0 : index
    %322 = vector.load %arg8[%321, %c0_126] : memref<8x128xf32, #tpu.memory_space<vmem>>, vector<8x128xf32>
    tpu.vector_store %arg8[%321, %c0_126], %320 {strides = array<i32>} : memref<8x128xf32, #tpu.memory_space<vmem>>, vector<8x128xf32>,
    %c1_i32_127 = arith.constant 1 : i32
    %c1_i32_128 = arith.constant 1 : i32
    %323 = arith.cmpi eq, %arg0, %c1_i32_128 : i32
    %324 = arith.extui %323 : i1 to i32
    %c0_i32_129 = arith.constant 0 : i32
    %325 = arith.cmpi ne, %324, %c0_i32_129 : i32
    scf.if %325 {
      %c0_130 = arith.constant 0 : index
      %c0_131 = arith.constant 0 : index
      %326 = vector.load %arg8[%c0_130, %c0_131] : memref<8x128xf32, #tpu.memory_space<vmem>>, vector<8x128xf32>
      %c0_132 = arith.constant 0 : index
      %c0_133 = arith.constant 0 : index
      %327 = vector.load %arg5[%c0_132, %c0_133] : memref<1x128xf32, #tpu.memory_space<vmem>>, vector<1x128xf32>
      %328 = vector.broadcast %327 : vector<1x128xf32> to vector<8x128xf32>
      %329 = arith.mulf %326, %328 : vector<8x128xf32>
      %cst_134 = arith.constant dense<0.000000e+00> : vector<8xf32>
      %330 = vector.multi_reduction <add>, %329, %cst_134 [1] : vector<8x128xf32> to vector<8xf32>
      %331 = vector.shape_cast %330 : vector<8xf32> to vector<8x1xf32>
      %c0_135 = arith.constant 0 : index
      %c0_136 = arith.constant 0 : index
      %332 = vector.load %arg6[%c0_135, %c0_136] : memref<1x1xf32, #tpu.memory_space<vmem>>, vector<1x1xf32>
      %333 = vector.broadcast %332 : vector<1x1xf32> to vector<8x1xf32>
      %334 = arith.addf %331, %333 : vector<8x1xf32>
      %335 = vector.shape_cast %334 : vector<8x1xf32> to vector<8x1xf32>
      %336 = vector.broadcast %335 : vector<8x1xf32> to vector<8x128xf32>
      %c0_137 = arith.constant 0 : index
      %c0_138 = arith.constant 0 : index
      %337 = vector.load %arg7[%c0_137, %c0_138] : memref<8x128xf32, #tpu.memory_space<vmem>>, vector<8x128xf32>
      tpu.vector_store %arg7[%c0_137, %c0_138], %336 {strides = array<i32>} : memref<8x128xf32, #tpu.memory_space<vmem>>, vector<8x128xf32>,
    } else {
    }
    return
  }
  func.func @transform_0(%arg0: i32) -> (i32, i32) {
    %c0_i32 = arith.constant 0 : i32
    %c0_i32_0 = arith.constant 0 : i32
    %c0_i32_1 = arith.constant 0 : i32
    return %c0_i32, %c0_i32_0 : i32, i32
  }
  func.func @transform_1(%arg0: i32) -> (i32, i32, i32) {
    %c0_i32 = arith.constant 0 : i32
    %c0_i32_0 = arith.constant 0 : i32
    %c0_i32_1 = arith.constant 0 : i32
    return %arg0, %c0_i32, %c0_i32_0 : i32, i32, i32
  }
  func.func @transform_2(%arg0: i32) -> (i32, i32, i32) {
    %c0_i32 = arith.constant 0 : i32
    %c0_i32_0 = arith.constant 0 : i32
    %c0_i32_1 = arith.constant 0 : i32
    return %arg0, %c0_i32, %c0_i32_0 : i32, i32, i32
  }
  func.func @transform_3(%arg0: i32) -> (i32, i32, i32) {
    %c0_i32 = arith.constant 0 : i32
    %c0_i32_0 = arith.constant 0 : i32
    %c0_i32_1 = arith.constant 0 : i32
    return %arg0, %c0_i32, %c0_i32_0 : i32, i32, i32
  }
  func.func @transform_4(%arg0: i32) -> (i32, i32) {
    %c0_i32 = arith.constant 0 : i32
    %c0_i32_0 = arith.constant 0 : i32
    %c0_i32_1 = arith.constant 0 : i32
    return %c0_i32, %c0_i32_0 : i32, i32
  }
  func.func @transform_5(%arg0: i32) -> (i32, i32) {
    %c0_i32 = arith.constant 0 : i32
    %c0_i32_0 = arith.constant 0 : i32
    %c0_i32_1 = arith.constant 0 : i32
    return %c0_i32, %c0_i32_0 : i32, i32
  }
  func.func @transform_6(%arg0: i32) -> (i32, i32) {
    %c0_i32 = arith.constant 0 : i32
    %c0_i32_0 = arith.constant 0 : i32
    %c0_i32_1 = arith.constant 0 : i32
    return %c0_i32, %c0_i32_0 : i32, i32
  }
}

</mosaic_0001>

<bundles_post_ra>
// kernel: tpu_custom_call.1
= control target key start
LH: loop header
LB: loop body
LE: loop exit
PB: predicated region body
PF: predicated region fallthrough
CT: control target
= control target key end

     0   :  { %s4303_s0 = inlined_call_operand.hbm [shape: f32[8,128], index: 0, kind: input, shape index: {}]   ;;  %s4304_s1 = inlined_call_operand.hbm [shape: f32[2,128,512], index: 1, kind: input, shape index: {}]   ;;  %s4305_s2 = inlined_call_operand.hbm [shape: f32[2,128,512], index: 2, kind: input, shape index: {}]   ;;  %s4306_s3 = inlined_call_operand.hbm [shape: f32[2,1,512], index: 3, kind: input, shape index: {}]   ;;  %s4307_s4 = inlined_call_operand.vmem [shape: f32[1,128], index: 4, kind: input, shape index: {}]   ;;  %s4308_s5 = inlined_call_operand.<no memory space> [shape: f32[1,1], index: 5, kind: input, shape index: {}]   ;;  %s4309_s6 = inlined_call_operand.hbm [shape: f32[8,128], index: 6, kind: output, shape index: {}]  }
   0x1   :  { %v11_v0 = vstv %s4308_s5 }
   0x2   :  { %12 = vst [vmem:[#allocation4] sm:$0x1] %v11_v0 }
   0x3   :  { %13 = vsyncpa [#allocation6], 0 }
   0x4   :  { %14 = vsyncpa [#allocation9], 0 }
   0x5   :  { %16 = vsyncpa [#allocation9 + $0x1], 0 }
   0x6   :  { %17 = vsyncpa [#allocation12], 0 }
   0x7   :  { %19 = vsyncpa [#allocation12 + $0x1], 0 }
   0x8   :  { %20 = vsyncpa [#allocation7], 0  ;;  %s2996_s23 = smov 0   ;;  %s2998_s24 = smov 0  }
   0x9   :  { %s3000_s25 = smov 0   ;;  %s3002_s26 = smov 0  }
   0xa LB: > { %s3017_s5 = sadd.s32 1, %s2946_s26   ;;  %s54_s27 = sadd.s32 1, %s2942_s25  ;;  %s2946_s26 = sphi %s3002_s26, %s4586_s26   ;;  %s2942_s25 = sphi %s3000_s25, %s4585_s25   ;;  %s2938_s24 = sphi %s2998_s24, %s4584_s24   ;;  %s2934_s23 = sphi %s2996_s23, %s4583_s23  }
   0xb   : > { %s51_s28 = ssub.s32 %s2946_s26, %s3017_s5  ;;  %p61_p0 = scmp.ne.s32.totalorder %s2942_s25, %s2938_s24 }
   0xc   : > { %p52_p1 = scmp.eq.s32.totalorder %s51_s28, 0  ;;  %p62_p2 = scmp.eq.s32.totalorder %s2946_s26, 0 }
   0xd   : > { %p2578_p3 = scmp.lt.s32.totalorder %s2946_s26, 2  ;;  %s223_s30 = sand.u32 1, %s2946_s26  }
   0xe   : > { %s3027_s29 = scalar_select %p52_p1, %s2942_s25, %s54_s27  }
   0xf   : > { %p63_p4 = por %p62_p2, %p61_p0  ;;  %s3031_s7 = sand.u32 1, %s2942_s25  }
  0x10   : > { %s2524_s8 = sshll.u32 %s3031_s7, 9  ;;  %s2546_s9 = sshll.u32 %s2946_s26, 13 }
  0x11   : > { %s3040_s12 = scalar_lea.hbm %s4304_s1, %s2546_s9  ;;  %s227_s13 = scalar_lea.vmem [#allocation8], %s2524_s8 }
  0x12   : > { %s234_s14 = sshll.u32 %s227_s13, 4  ;;  %p3044_p5 = pnand %p2578_p3, %p63_p4  ;;  %s3048_s14 = int_to_ptr.vmem [resolvable:$true] %s234_s14 }
  0x13   : > { %s3050_s16 = scalar_lea.sflag [#allocation9], %s223_s30  ;;  %s2766_s17 = scalar_lea.hbm %s3040_s12, 8192 }
  0x14   : > { %p2767_p6 = scmp.ne.s32.totalorder %s3040_s12, %s2766_s17  ;;  %p3056_p7 = pneg %p3044_p5 }
  0x15   : > { %s2771_s21 = scalar_lea.hbm %s4304_s1, 16384  ;;  %p2772_p10 = scmp.lt.s32.totalorder %s3040_s12, %s4304_s1 }
  0x16   : > { %p2769_p8 = pnand %p3056_p7, %p2767_p6  ;;  %p2773_p11 = scmp.lt.s32.totalorder %s2771_s21, %s2766_s17 }
  0x18   : > { %p2770_p9 = pneg %p2769_p8  ;;  %p2774_p12 = por %p2773_p11, %p2772_p10 }
  0x1a   : > { %p2775_p13 = pnand %p2774_p12, %p2770_p9 }
  0x1c   : > { %2778 = shalt.err (!%p2775_p13)
}
  0x1d   : > { %s2779_s28 = scalar_lea.vmem %s3048_s14, 8192  ;;  %s2948_s30 = smov [#allocation8]  }
  0x1e   : > { %p2780_p0 = scmp.ne.s32.totalorder %s3048_s14, %s2779_s28  ;;  %s2784_s10 = sshll.u32 %s2948_s30, 4  ;;  %s2785_s10 = int_to_ptr.vmem [resolvable:$false] %s2784_s10 }
  0x1f   : > { %s2786_s11 = scalar_lea.vmem %s2785_s10, 16384  ;;  %p2787_p3 = scmp.lt.s32.totalorder %s3048_s14, %s2785_s10 }
  0x20   : > { %p2782_p1 = pnand %p2780_p0, %p3056_p7  ;;  %p2788_p4 = scmp.lt.s32.totalorder %s2786_s11, %s2779_s28 }
  0x22   : > { %p2783_p2 = pneg %p2782_p1  ;;  %p2789_p6 = por %p2788_p4, %p2787_p3 }
  0x24   : > { %p2790_p8 = pnand %p2789_p6, %p2783_p2 }
  0x26   : > { %2793 = shalt.err (!%p2790_p8)
}
  0x27   : > { %s2949_s13 = smov 512   ;;  %s2950_s17 = smov 32  }
  0x28   : > { %2570 = dma.hbm_to_vmem [thread:$0]  (!%p3044_p5), %s3040_s12, 8192, %s3048_s14, %s3050_s16, %s2949_s13, %s2949_s13, %s2950_s17  }
  0x29   : > { %s3087_s21 = scalar_lea.hbm %s4305_s2, %s2546_s9  ;;  %s248_s22 = scalar_lea.vmem [#allocation10], %s2524_s8 }
  0x2a   : > { %s255_s27 = sshll.u32 %s248_s22, 4  ;;  %s3094_s28 = sadd.s32 4294967295, %s2946_s26   ;;  %s3091_s27 = int_to_ptr.vmem [resolvable:$true] %s255_s27 }
  0x2b   : > { %p67_p9 = scmp.ne.s32.totalorder %s2938_s24, %s2934_s23  ;;  %p4310_p10 = scmp.eq.s32.totalorder %s3094_s28, 0 }
  0x2c   : > { %p2521_p11 = scmp.ge.s32.totalorder %s2946_s26, 1  ;;  %p193_p12 = scmp.lt.s32.totalorder %s2946_s26, 3 }
  0x2d   : > { %p3104_p0 = por %p4310_p10, %p67_p9  ;;  %s2951_s12 = smov [#allocation5]  }
  0x2e   : > { %p3108_p1 = pnand %p2521_p11, %p193_p12  ;;  %s206_s14 = sshll.u32 %s2951_s12, 4  ;;  %s3112_s14 = int_to_ptr.vmem [resolvable:$true] %s206_s14 }
  0x2f   : > { %s4413_s8 = scalar_select %p3104_p0, 1, 0 }
  0x30   : > { %s4414_s9 = scalar_select %p3108_p1, 1, 0 }
  0x31   : > { %s2794_s30 = scalar_lea.hbm %s3087_s21, 8192  ;;  %s2799_s19 = scalar_lea.hbm %s4305_s2, 16384 }
  0x32   : > { %p2795_p3 = scmp.ne.s32.totalorder %s3087_s21, %s2794_s30  ;;  %p2800_p8 = scmp.lt.s32.totalorder %s3087_s21, %s4305_s2 }
  0x33   : > { %p2801_p9 = scmp.lt.s32.totalorder %s2799_s19, %s2794_s30 }
  0x34   : > { %p2797_p4 = pnand %p2795_p3, %p3056_p7 }
  0x35   : > { %p2802_p11 = por %p2801_p9, %p2800_p8 }
  0x36   : > { %p2798_p6 = pneg %p2797_p4 }
  0x38   : > { %p2803_p12 = pnand %p2802_p11, %p2798_p6 }
  0x3a   : > { %2806 = shalt.err (!%p2803_p12)
}
  0x3b   : > { %s2807_s12 = scalar_lea.vmem %s3091_s27, 8192  ;;  %s2952_s23 = smov [#allocation10]  }
  0x3c   : > { %p2808_p13 = scmp.ne.s32.totalorder %s3091_s27, %s2807_s12  ;;  %s2812_s10 = sshll.u32 %s2952_s23, 4  ;;  %s2813_s10 = int_to_ptr.vmem [resolvable:$false] %s2812_s10 }
  0x3d   : > { %s2814_s11 = scalar_lea.vmem %s2813_s10, 16384  ;;  %p2815_p2 = scmp.lt.s32.totalorder %s3091_s27, %s2813_s10 }
  0x3e   : > { %p2810_p3 = pnand %p2808_p13, %p3056_p7  ;;  %p2816_p10 = scmp.lt.s32.totalorder %s2814_s11, %s2807_s12 }
  0x40   : > { %p2811_p4 = pneg %p2810_p3  ;;  %p2817_p0 = por %p2816_p10, %p2815_p2 }
  0x42   : > { %p2818_p1 = pnand %p2817_p0, %p2811_p4 }
  0x44   : > { %2821 = shalt.err (!%p2818_p1)
}
  0x45   : > { %2573 = dma.hbm_to_vmem [thread:$0]  (!%p3044_p5), %s3087_s21, 8192, %s3091_s27, %s3050_s16, %s2949_s13, %s2949_s13, %s2950_s17  }
  0x46   : > { %p4415_p13 = scmp.eq.s32.totalorder %s3094_s28, 0  ;;  %p4416_p10 = scmp.ne.s32.totalorder %s4414_s9, 0 }
  0x47   : > { %s2548_s30 = sshll.u32 %s2946_s26, 6  ;;  %s4419_s19 = sshll.u32 %s3031_s7, 2 }
  0x48   : > { %p4417_p0 = pneg %p4416_p10  ;;  %s269_s20 = scalar_lea.vmem [#allocation11], %s4419_s19 }
  0x49   : > { %s277_s22 = sshll.u32 %s269_s20, 4  ;;  %s3156_s11 = scalar_lea.hbm %s4306_s3, %s2548_s30  ;;  %s278_s22 = int_to_ptr.vmem [resolvable:$true] %s277_s22 }
  0x4a   : > { %p3146_p1 = pnand %p4417_p0, %p4415_p13  ;;  %s2833_s16 = scalar_lea.vmem %s3112_s14, 128 }
  0x4b   : > { %p2834_p6 = scmp.ne.s32.totalorder %s3112_s14, %s2833_s16  ;;  %p2841_p11 = scmp.lt.s32.totalorder %s3112_s14, %s3112_s14 }
  0x4c   : > { %p2824_p2 = pneg %p3146_p1  ;;  %p2842_p12 = scmp.lt.s32.totalorder %s2833_s16, %s2833_s16 }
  0x4e   : > { %p2836_p8 = pnand %p2834_p6, %p2824_p2  ;;  %p2843_p3 = por %p2842_p12, %p2841_p11 }
  0x50   : > { %p2837_p9 = pneg %p2836_p8 }
  0x52   : > { %p2844_p4 = pnand %p2843_p3, %p2837_p9 }
  0x54   : > { %2847 = shalt.err (!%p2844_p4)
}
  0x55   : > { %2566 = dma.hbm_to_vmem [thread:$0]  (!%p3146_p1), %s4303_s0, 128, %s3112_s14, [#allocation6]  }
  0x56   : > { %s266_s17 = scalar_lea.sflag [#allocation12], %s3031_s7  ;;  %s2848_s21 = scalar_lea.hbm %s3156_s11, 64 }
  0x57   : > { %p2849_p13 = scmp.ne.s32.totalorder %s3156_s11, %s2848_s21  ;;  %s2853_s23 = scalar_lea.hbm %s4306_s3, 128 }
  0x58   : > { %p2854_p6 = scmp.lt.s32.totalorder %s3156_s11, %s4306_s3  ;;  %p2855_p8 = scmp.lt.s32.totalorder %s2853_s23, %s2848_s21 }
  0x59   : > { %p2851_p0 = pnand %p2849_p13, %p3056_p7 }
  0x5a   : > { %p2856_p9 = por %p2855_p8, %p2854_p6 }
  0x5b   : > { %p2852_p2 = pneg %p2851_p0 }
  0x5d   : > { %p2857_p11 = pnand %p2856_p9, %p2852_p2 }
  0x5f   : > { %2860 = shalt.err (!%p2857_p11)
}
  0x60   : > { %s2861_s14 = scalar_lea.vmem %s278_s22, 64  ;;  %s2953_s7 = smov [#allocation11]  }
  0x61   : > { %p2862_p1 = scmp.ne.s32.totalorder %s278_s22, %s2861_s14  ;;  %s2866_s12 = sshll.u32 %s2953_s7, 4  ;;  %s2867_s12 = int_to_ptr.vmem [resolvable:$false] %s2866_s12 }
  0x62   : > { %s2868_s10 = scalar_lea.vmem %s2867_s12, 128  ;;  %p2869_p4 = scmp.lt.s32.totalorder %s278_s22, %s2867_s12 }
  0x63   : > { %p2864_p12 = pnand %p2862_p1, %p3056_p7  ;;  %p2870_p13 = scmp.lt.s32.totalorder %s2868_s10, %s2861_s14 }
  0x65   : > { %p2865_p3 = pneg %p2864_p12  ;;  %p2871_p0 = por %p2870_p13, %p2869_p4 }
  0x67   : > { %p2872_p10 = pnand %p2871_p0, %p2865_p3 }
  0x69   : > { %2875 = shalt.err (!%p2872_p10)
}
  0x6a   : > { %2576 = dma.hbm_to_vmem [thread:$0]  (!%p3044_p5), %s3156_s11, 64, %s278_s22, %s266_s17  }
  0x6b   : > { %p4420_p2 = scmp.ne.s32.totalorder %s4414_s9, 0 }
  0x6d   : > { %286 = sbr.rel (%p4420_p2) target bundleno = 2471 (0x9a7), region = 44 }
  0x72   : > { %p4421_p6 = scmp.eq.s32.totalorder %s3094_s28, 0 }
  0x74   : > { %2917 = dma.done.wait (%p4421_p6), [#allocation6], 128   ;;  %p4422_p7 = pmov %p4421_p6 }
  0x75   : > { %s292_s18 = sand.u32 1, %s3094_s28   ;;  %s294_s16 = sand.u32 1, %s2938_s24  }
  0x76   : > { %2919 = vsyncadd (%p4422_p7), [#allocation6], 4294967168  ;;  %s2535_s26 = sshll.u32 %s294_s16, 9  ;;  %s293_s13 = scalar_lea.sflag [#allocation9], %s292_s18 }
  0x77   : > { %s3195_s21 = scalar_lea.vmem [#allocation8], %s2535_s26  ;;  %p4423_p10 = scmp.ne.s32.totalorder %s4413_s8, 0 }
  0x79   : > { %2921 = dma.done.wait (%p4423_p10), %s293_s13, 16384  }
  0x7a   : > { %2923 = vsyncadd (%p4423_p10), %s293_s13, 4294950912  ;;  %s2537_s15 = sshll.u32 %s294_s16, 2  ;;  %s3201_s9 = scalar_lea.vmem [#allocation10], %s2535_s26 }
  0x7b   : > { %s311_s22 = scalar_lea.sflag [#allocation12], %s294_s16  ;;  %s3203_s11 = scalar_lea.vmem [#allocation11], %s2537_s15 }
  0x7c   : > { %2925 = dma.done.wait (%p4423_p10), %s311_s22, 64  }
  0x7d   : > { %2927 = vsyncadd (%p4423_p10), %s311_s22, 4294967232  ;;  %p4424_p5 = scmp.ne.s32.totalorder %s3094_s28, 0 }
  0x7f   : > { %351 = sbr.rel (%p4424_p5) target bundleno = 134 (0x86), region = 64 }
  0x84   : > { %v352_v1 = vld [vmem:[#allocation5] sm:$0xff] }
  0x85   : > { %353 = vst [vmem:[#allocation2] sm:$0xff] %v352_v1 }
  0x86 PF: > { %v416_v2 = vld [vmem:[%s3195_s21 + $0x1e8] sm:$0xff]  ;;  %v418_v3 = vld [vmem:[%s3195_s21 + $0x1f8] sm:$0xff]  ;;  %v415_v4 = vld [vmem:[%s3195_s21 + $0x1e0] sm:$0xff]  ;;  %vm2343_vm0 = vcmask 1040384   ;;  %vm2345_vm1 = vcmask 1041408   ;;  %vm2347_vm2 = vcmask 1042432  }
  0x87   : > { %441 = vmatprep.subr.mxu0 %v416_v2  ;;  %512 = vmatprep.subr.mxu1 %v418_v3  ;;  %v417_v5 = vld [vmem:[%s3195_s21 + $0x1f0] sm:$0xff]  ;;  %v412_v6 = vld [vmem:[%s3195_s21 + $0x1c8] sm:$0xff]  ;;  %v414_v7 = vld [vmem:[%s3195_s21 + $0x1d8] sm:$0xff]  ;;  %v4314_v3 = vmov 0.0   ;;  %vm2349_vm3 = vcmask 1043456   ;;  %vm2351_vm4 = vcmask 1044480  }
  0x88   : > { %442 = vmatpush1.msra.mxu0 %v415_v4  ;;  %513 = vmatpush1.msra.mxu1 %v417_v5  ;;  %v411_v8 = vld [vmem:[%s3195_s21 + $0x1c0] sm:$0xff]  ;;  %v413_v9 = vld [vmem:[%s3195_s21 + $0x1d0] sm:$0xff]  ;;  %v408_v10 = vld [vmem:[%s3195_s21 + $0x1a8] sm:$0xff]  ;;  %vm2353_vm5 = vcmask 1045504   ;;  %vm2355_vm6 = vcmask 1046528   ;;  %p2539_p8 = scmp.ne.s32.totalorder %s3094_s28, 1 }
  0x89   : > { %443 = vmatprep.subr.mxu0 %v412_v6  ;;  %514 = vmatprep.subr.mxu1 %v414_v7  ;;  %v410_v11 = vld [vmem:[%s3195_s21 + $0x1b8] sm:$0xff]  ;;  %v407_v12 = vld [vmem:[%s3195_s21 + $0x1a0] sm:$0xff]  ;;  %v409_v13 = vld [vmem:[%s3195_s21 + $0x1b0] sm:$0xff] }
  0x8a   : > { %444 = vmatpush1.msra.mxu0 %v411_v8  ;;  %515 = vmatpush1.msra.mxu1 %v413_v9  ;;  %v404_v14 = vld [vmem:[%s3195_s21 + $0x188] sm:$0xff]  ;;  %v406_v15 = vld [vmem:[%s3195_s21 + $0x198] sm:$0xff]  ;;  %v403_v16 = vld [vmem:[%s3195_s21 + $0x180] sm:$0xff] }
  0x8b   : > { %445 = vmatprep.subr.mxu0 %v408_v10  ;;  %516 = vmatprep.subr.mxu1 %v410_v11  ;;  %v405_v17 = vld [vmem:[%s3195_s21 + $0x190] sm:$0xff]  ;;  %v400_v18 = vld [vmem:[%s3195_s21 + $0x168] sm:$0xff]  ;;  %v402_v19 = vld [vmem:[%s3195_s21 + $0x178] sm:$0xff] }
  0x8c   : > { %446 = vmatpush1.msra.mxu0 %v407_v12  ;;  %517 = vmatpush1.msra.mxu1 %v409_v13  ;;  %v399_v20 = vld [vmem:[%s3195_s21 + $0x160] sm:$0xff]  ;;  %v401_v21 = vld [vmem:[%s3195_s21 + $0x170] sm:$0xff]  ;;  %v396_v22 = vld [vmem:[%s3195_s21 + $0x148] sm:$0xff] }
  0x8d   : > { %447 = vmatprep.subr.mxu0 %v404_v14  ;;  %518 = vmatprep.subr.mxu1 %v406_v15  ;;  %v398_v23 = vld [vmem:[%s3195_s21 + $0x158] sm:$0xff]  ;;  %v395_v24 = vld [vmem:[%s3195_s21 + $0x140] sm:$0xff]  ;;  %v397_v25 = vld [vmem:[%s3195_s21 + $0x150] sm:$0xff] }
  0x8e   : > { %448 = vmatpush1.msra.mxu0 %v403_v16  ;;  %519 = vmatpush1.msra.mxu1 %v405_v17  ;;  %v392_v26 = vld [vmem:[%s3195_s21 + $0x128] sm:$0xff]  ;;  %v394_v27 = vld [vmem:[%s3195_s21 + $0x138] sm:$0xff]  ;;  %v391_v28 = vld [vmem:[%s3195_s21 + $0x120] sm:$0xff] }
  0x8f   : > { %449 = vmatprep.subr.mxu0 %v400_v18  ;;  %520 = vmatprep.subr.mxu1 %v402_v19  ;;  %v393_v29 = vld [vmem:[%s3195_s21 + $0x130] sm:$0xff]  ;;  %v388_v30 = vld [vmem:[%s3195_s21 + $0x108] sm:$0xff]  ;;  %v390_v31 = vld [vmem:[%s3195_s21 + $0x118] sm:$0xff] }
  0x90   : > { %450 = vmatpush1.msra.mxu0 %v399_v20  ;;  %521 = vmatpush1.msra.mxu1 %v401_v21  ;;  %v387_v32 = vld [vmem:[%s3195_s21 + $0x100] sm:$0xff]  ;;  %v389_v33 = vld [vmem:[%s3195_s21 + $0x110] sm:$0xff]  ;;  %v384_v34 = vld [vmem:[%s3195_s21 + $0xe8] sm:$0xff] }
  0x91   : > { %451 = vmatprep.subr.mxu0 %v396_v22  ;;  %522 = vmatprep.subr.mxu1 %v398_v23  ;;  %v386_v35 = vld [vmem:[%s3195_s21 + $0xf8] sm:$0xff]  ;;  %v383_v36 = vld [vmem:[%s3195_s21 + $0xe0] sm:$0xff]  ;;  %v385_v37 = vld [vmem:[%s3195_s21 + $0xf0] sm:$0xff] }
  0x92   : > { %452 = vmatpush1.msra.mxu0 %v395_v24  ;;  %523 = vmatpush1.msra.mxu1 %v397_v25  ;;  %v380_v38 = vld [vmem:[%s3195_s21 + $0xc8] sm:$0xff]  ;;  %v382_v39 = vld [vmem:[%s3195_s21 + $0xd8] sm:$0xff]  ;;  %v379_v40 = vld [vmem:[%s3195_s21 + $0xc0] sm:$0xff] }
  0x93   : > { %453 = vmatprep.subr.mxu0 %v392_v26  ;;  %524 = vmatprep.subr.mxu1 %v394_v27  ;;  %v381_v41 = vld [vmem:[%s3195_s21 + $0xd0] sm:$0xff]  ;;  %v376_v42 = vld [vmem:[%s3195_s21 + $0xa8] sm:$0xff]  ;;  %v378_v43 = vld [vmem:[%s3195_s21 + $0xb8] sm:$0xff] }
  0x94   : > { %454 = vmatpush1.msra.mxu0 %v391_v28  ;;  %525 = vmatpush1.msra.mxu1 %v393_v29  ;;  %v375_v44 = vld [vmem:[%s3195_s21 + $0xa0] sm:$0xff]  ;;  %v377_v45 = vld [vmem:[%s3195_s21 + $0xb0] sm:$0xff]  ;;  %v372_v46 = vld [vmem:[%s3195_s21 + $0x88] sm:$0xff] }
  0x95   : > { %455 = vmatprep.subr.mxu0 %v388_v30  ;;  %526 = vmatprep.subr.mxu1 %v390_v31  ;;  %v374_v47 = vld [vmem:[%s3195_s21 + $0x98] sm:$0xff]  ;;  %v371_v48 = vld [vmem:[%s3195_s21 + $0x80] sm:$0xff]  ;;  %v373_v49 = vld [vmem:[%s3195_s21 + $0x90] sm:$0xff] }
  0x96   : > { %456 = vmatpush1.msra.mxu0 %v387_v32  ;;  %527 = vmatpush1.msra.mxu1 %v389_v33  ;;  %v368_v50 = vld [vmem:[%s3195_s21 + $0x68] sm:$0xff]  ;;  %v370_v51 = vld [vmem:[%s3195_s21 + $0x78] sm:$0xff]  ;;  %v367_v52 = vld [vmem:[%s3195_s21 + $0x60] sm:$0xff] }
  0x97   : > { %457 = vmatprep.subr.mxu0 %v384_v34  ;;  %528 = vmatprep.subr.mxu1 %v386_v35  ;;  %v369_v53 = vld [vmem:[%s3195_s21 + $0x70] sm:$0xff]  ;;  %v364_v54 = vld [vmem:[%s3195_s21 + $0x48] sm:$0xff]  ;;  %v366_v55 = vld [vmem:[%s3195_s21 + $0x58] sm:$0xff] }
  0x98   : > { %458 = vmatpush1.msra.mxu0 %v383_v36  ;;  %529 = vmatpush1.msra.mxu1 %v385_v37  ;;  %v363_v56 = vld [vmem:[%s3195_s21 + $0x40] sm:$0xff]  ;;  %v365_v57 = vld [vmem:[%s3195_s21 + $0x50] sm:$0xff]  ;;  %v360_v58 = vld [vmem:[%s3195_s21 + $0x28] sm:$0xff] }
  0x99   : > { %459 = vmatprep.subr.mxu0 %v380_v38  ;;  %530 = vmatprep.subr.mxu1 %v382_v39  ;;  %v362_v59 = vld [vmem:[%s3195_s21 + $0x38] sm:$0xff]  ;;  %v359_v60 = vld [vmem:[%s3195_s21 + $0x20] sm:$0xff]  ;;  %v361_v61 = vld [vmem:[%s3195_s21 + $0x30] sm:$0xff] }
  0x9a   : > { %460 = vmatpush1.msra.mxu0 %v379_v40  ;;  %531 = vmatpush1.msra.mxu1 %v381_v41  ;;  %v356_v62 = vld [vmem:[%s3195_s21 + $0x8] sm:$0xff]  ;;  %v358_v63 = vld [vmem:[%s3195_s21 + $0x18] sm:$0xff]  ;;  %v355_v0 = vld [vmem:[%s3195_s21] sm:$0xff] }
  0x9b   : > { %461 = vmatprep.subr.mxu0 %v376_v42  ;;  %532 = vmatprep.subr.mxu1 %v378_v43  ;;  %v357_v1 = vld [vmem:[%s3195_s21 + $0x10] sm:$0xff]  ;;  %v3277_v4 = vld [vmem:[%s3201_s9 + $0x1e8] sm:$0xff]  ;;  %v3280_v5 = vld [vmem:[%s3201_s9 + $0x1f8] sm:$0xff] }
  0x9c   : > { %462 = vmatpush1.msra.mxu0 %v375_v44  ;;  %533 = vmatpush1.msra.mxu1 %v377_v45  ;;  %v354_v2 = vld [vmem:[#allocation2] sm:$0xff]  ;;  %4425 = vst [vmem:[#allocation18_spill] sm:$0xff] %v3277_v4  ;;  %4426 = vst [vmem:[#allocation19_spill] sm:$0xff] %v3280_v5  ;;  %v3284_v6 = vld [vmem:[%s3201_s9 + $0x1e0] sm:$0xff] }
  0x9d   : > { %463 = vmatprep.subr.mxu0 %v372_v46  ;;  %534 = vmatprep.subr.mxu1 %v374_v47  ;;  %v3287_v7 = vld [vmem:[%s3201_s9 + $0x1f0] sm:$0xff]  ;;  %v3290_v8 = vld [vmem:[%s3201_s9 + $0x1c8] sm:$0xff]  ;;  %v3293_v9 = vld [vmem:[%s3201_s9 + $0x1d8] sm:$0xff] }
  0x9e   : > { %464 = vmatpush1.msra.mxu0 %v371_v48  ;;  %535 = vmatpush1.msra.mxu1 %v373_v49  ;;  %v3298_v10 = vld [vmem:[%s3201_s9 + $0x1c0] sm:$0xff]  ;;  %v3301_v11 = vld [vmem:[%s3201_s9 + $0x1d0] sm:$0xff]  ;;  %v3306_v12 = vld [vmem:[%s3201_s9 + $0x1a8] sm:$0xff] }
  0x9f   : > { %465 = vmatprep.subr.mxu0 %v368_v50  ;;  %536 = vmatprep.subr.mxu1 %v370_v51  ;;  %v3309_v13 = vld [vmem:[%s3201_s9 + $0x1b8] sm:$0xff]  ;;  %v3314_v14 = vld [vmem:[%s3201_s9 + $0x1a0] sm:$0xff]  ;;  %v3317_v15 = vld [vmem:[%s3201_s9 + $0x1b0] sm:$0xff] }
  0xa0   : > { %466 = vmatpush1.msra.mxu0 %v367_v52  ;;  %537 = vmatpush1.msra.mxu1 %v369_v53  ;;  %v3322_v16 = vld [vmem:[%s3201_s9 + $0x188] sm:$0xff]  ;;  %v3325_v17 = vld [vmem:[%s3201_s9 + $0x198] sm:$0xff]  ;;  %v3330_v18 = vld [vmem:[%s3201_s9 + $0x180] sm:$0xff] }
  0xa1   : > { %467 = vmatprep.subr.mxu0 %v364_v54  ;;  %538 = vmatprep.subr.mxu1 %v366_v55  ;;  %v3333_v19 = vld [vmem:[%s3201_s9 + $0x190] sm:$0xff]  ;;  %v3338_v20 = vld [vmem:[%s3201_s9 + $0x168] sm:$0xff]  ;;  %v3341_v21 = vld [vmem:[%s3201_s9 + $0x178] sm:$0xff] }
  0xa2   : > { %468 = vmatpush1.msra.mxu0 %v363_v56  ;;  %539 = vmatpush1.msra.mxu1 %v365_v57  ;;  %v3346_v22 = vld [vmem:[%s3201_s9 + $0x160] sm:$0xff]  ;;  %v3349_v23 = vld [vmem:[%s3201_s9 + $0x170] sm:$0xff]  ;;  %v3354_v24 = vld [vmem:[%s3201_s9 + $0x148] sm:$0xff] }
  0xa3   : > { %469 = vmatprep.subr.mxu0 %v360_v58  ;;  %540 = vmatprep.subr.mxu1 %v362_v59  ;;  %v3357_v25 = vld [vmem:[%s3201_s9 + $0x158] sm:$0xff]  ;;  %v3362_v26 = vld [vmem:[%s3201_s9 + $0x140] sm:$0xff]  ;;  %v3365_v27 = vld [vmem:[%s3201_s9 + $0x150] sm:$0xff] }
  0xa4   : > { %470 = vmatpush1.msra.mxu0 %v359_v60  ;;  %541 = vmatpush1.msra.mxu1 %v361_v61  ;;  %v3370_v28 = vld [vmem:[%s3201_s9 + $0x128] sm:$0xff]  ;;  %v3373_v29 = vld [vmem:[%s3201_s9 + $0x138] sm:$0xff]  ;;  %v3378_v30 = vld [vmem:[%s3201_s9 + $0x120] sm:$0xff] }
  0xa5   : > { %471 = vmatprep.subr.mxu0 %v356_v62  ;;  %542 = vmatprep.subr.mxu1 %v358_v63  ;;  %v3381_v31 = vld [vmem:[%s3201_s9 + $0x130] sm:$0xff]  ;;  %v3386_v32 = vld [vmem:[%s3201_s9 + $0x108] sm:$0xff]  ;;  %v3389_v33 = vld [vmem:[%s3201_s9 + $0x118] sm:$0xff] }
  0xa6   : > { %472 = vmatpush1.msra.mxu0 %v355_v0  ;;  %505 = vmatprep.mubr.f32.mxu0 %v4314_v3  ;;  %v3394_v34 = vld [vmem:[%s3201_s9 + $0x100] sm:$0xff]  ;;  %v3397_v35 = vld [vmem:[%s3201_s9 + $0x110] sm:$0xff]  ;;  %v3402_v36 = vld [vmem:[%s3201_s9 + $0xe8] sm:$0xff] }
  0xa7   : > { %543 = vmatpush1.msra.mxu1 %v357_v1  ;;  %576 = vmatprep.mubr.f32.mxu1 %v4314_v3  ;;  %v3405_v37 = vld [vmem:[%s3201_s9 + $0xf8] sm:$0xff]  ;;  %v3410_v38 = vld [vmem:[%s3201_s9 + $0xe0] sm:$0xff]  ;;  %v3413_v39 = vld [vmem:[%s3201_s9 + $0xf0] sm:$0xff] }
  0xa8   : > { %506 = vmatmul.mubr.f32.vlgmr.msra.gmra.mxu0 %v354_v2  ;;  %577 = vmatmul.mubr.f32.vlgmr.msra.gmra.mxu1 %v354_v2  ;;  %v3418_v40 = vld [vmem:[%s3201_s9 + $0xc8] sm:$0xff]  ;;  %v3421_v41 = vld [vmem:[%s3201_s9 + $0xd8] sm:$0xff]  ;;  %v3426_v42 = vld [vmem:[%s3201_s9 + $0xc0] sm:$0xff] }
  0xa9   : > { %655 = vmatprep.subr.mxu0 %v3277_v4  ;;  %726 = vmatprep.subr.mxu1 %v3280_v5  ;;  %v3429_v43 = vld [vmem:[%s3201_s9 + $0xd0] sm:$0xff]  ;;  %v3434_v44 = vld [vmem:[%s3201_s9 + $0xa8] sm:$0xff]  ;;  %v3437_v45 = vld [vmem:[%s3201_s9 + $0xb8] sm:$0xff] }
  0xaa   : > { %656 = vmatpush1.msra.mxu0 %v3284_v6  ;;  %727 = vmatpush1.msra.mxu1 %v3287_v7  ;;  %v3442_v46 = vld [vmem:[%s3201_s9 + $0xa0] sm:$0xff]  ;;  %v3445_v47 = vld [vmem:[%s3201_s9 + $0xb0] sm:$0xff]  ;;  %v3450_v48 = vld [vmem:[%s3201_s9 + $0x88] sm:$0xff] }
  0xab   : > { %657 = vmatprep.subr.mxu0 %v3290_v8  ;;  %728 = vmatprep.subr.mxu1 %v3293_v9  ;;  %4427 = vst [vmem:[#allocation20_spill] sm:$0xff] %v3450_v48  ;;  %v3453_v49 = vld [vmem:[%s3201_s9 + $0x98] sm:$0xff]  ;;  %v3458_v50 = vld [vmem:[%s3201_s9 + $0x80] sm:$0xff]  ;;  %v3461_v51 = vld [vmem:[%s3201_s9 + $0x90] sm:$0xff] }
  0xac   : > { %658 = vmatpush1.msra.mxu0 %v3298_v10  ;;  %729 = vmatpush1.msra.mxu1 %v3301_v11  ;;  %4428 = vst [vmem:[#allocation21_spill] sm:$0xff] %v3453_v49  ;;  %4429 = vst [vmem:[#allocation22_spill] sm:$0xff] %v3458_v50  ;;  %v3466_v52 = vld [vmem:[%s3201_s9 + $0x68] sm:$0xff]  ;;  %v3469_v53 = vld [vmem:[%s3201_s9 + $0x78] sm:$0xff] }
  0xad   : > { %659 = vmatprep.subr.mxu0 %v3306_v12  ;;  %730 = vmatprep.subr.mxu1 %v3309_v13  ;;  %4430 = vst [vmem:[#allocation23_spill] sm:$0xff] %v3461_v51  ;;  %4431 = vst [vmem:[#allocation24_spill] sm:$0xff] %v3466_v52  ;;  %v3474_v54 = vld [vmem:[%s3201_s9 + $0x60] sm:$0xff]  ;;  %v3477_v55 = vld [vmem:[%s3201_s9 + $0x70] sm:$0xff] }
  0xae   : > { %660 = vmatpush1.msra.mxu0 %v3314_v14  ;;  %731 = vmatpush1.msra.mxu1 %v3317_v15  ;;  %4432 = vst [vmem:[#allocation25_spill] sm:$0xff] %v3469_v53  ;;  %4433 = vst [vmem:[#allocation26_spill] sm:$0xff] %v3474_v54  ;;  %v3482_v56 = vld [vmem:[%s3201_s9 + $0x48] sm:$0xff]  ;;  %v3485_v57 = vld [vmem:[%s3201_s9 + $0x58] sm:$0xff] }
  0xaf   : > { %661 = vmatprep.subr.mxu0 %v3322_v16  ;;  %732 = vmatprep.subr.mxu1 %v3325_v17  ;;  %4434 = vst [vmem:[#allocation27_spill] sm:$0xff] %v3477_v55  ;;  %4435 = vst [vmem:[#allocation28_spill] sm:$0xff] %v3482_v56  ;;  %v3490_v58 = vld [vmem:[%s3201_s9 + $0x40] sm:$0xff]  ;;  %v3493_v59 = vld [vmem:[%s3201_s9 + $0x50] sm:$0xff] }
  0xb0   : > { %662 = vmatpush1.msra.mxu0 %v3330_v18  ;;  %733 = vmatpush1.msra.mxu1 %v3333_v19  ;;  %4436 = vst [vmem:[#allocation29_spill] sm:$0xff] %v3485_v57  ;;  %4437 = vst [vmem:[#allocation30_spill] sm:$0xff] %v3490_v58  ;;  %v3498_v60 = vld [vmem:[%s3201_s9 + $0x28] sm:$0xff]  ;;  %v3501_v61 = vld [vmem:[%s3201_s9 + $0x38] sm:$0xff] }
  0xb1   : > { %663 = vmatprep.subr.mxu0 %v3338_v20  ;;  %734 = vmatprep.subr.mxu1 %v3341_v21  ;;  %4438 = vst [vmem:[#allocation31_spill] sm:$0xff] %v3493_v59  ;;  %4439 = vst [vmem:[#allocation32_spill] sm:$0xff] %v3498_v60  ;;  %v3506_v62 = vld [vmem:[%s3201_s9 + $0x20] sm:$0xff]  ;;  %v3509_v63 = vld [vmem:[%s3201_s9 + $0x30] sm:$0xff] }
  0xb2   : > { %664 = vmatpush1.msra.mxu0 %v3346_v22  ;;  %735 = vmatpush1.msra.mxu1 %v3349_v23  ;;  %4440 = vst [vmem:[#allocation33_spill] sm:$0xff] %v3501_v61  ;;  %4441 = vst [vmem:[#allocation34_spill] sm:$0xff] %v3506_v62  ;;  %v3514_v0 = vld [vmem:[%s3201_s9 + $0x8] sm:$0xff]  ;;  %v3517_v1 = vld [vmem:[%s3201_s9 + $0x18] sm:$0xff] }
  0xb3   : > { %665 = vmatprep.subr.mxu0 %v3354_v24  ;;  %736 = vmatprep.subr.mxu1 %v3357_v25  ;;  %4442 = vst [vmem:[#allocation35_spill] sm:$0xff] %v3509_v63  ;;  %4443 = vst [vmem:[#allocation36_spill] sm:$0xff] %v3514_v0  ;;  %v3522_v2 = vld [vmem:[%s3201_s9] sm:$0xff]  ;;  %v3527_v3 = vld [vmem:[%s3201_s9 + $0x10] sm:$0xff] }
  0xb4   : > { %666 = vmatpush1.msra.mxu0 %v3362_v26  ;;  %737 = vmatpush1.msra.mxu1 %v3365_v27  ;;  %4444 = vst [vmem:[#allocation37_spill] sm:$0xff] %v3517_v1  ;;  %4445 = vst [vmem:[#allocation38_spill] sm:$0xff] %v3522_v2 }
  0xb5   : > { %667 = vmatprep.subr.mxu0 %v3370_v28  ;;  %738 = vmatprep.subr.mxu1 %v3373_v29  ;;  %4446 = vst [vmem:[#allocation39_spill] sm:$0xff] %v3527_v3 }
  0xb6   : > { %668 = vmatpush1.msra.mxu0 %v3378_v30  ;;  %739 = vmatpush1.msra.mxu1 %v3381_v31 }
  0xb7   : > { %669 = vmatprep.subr.mxu0 %v3386_v32  ;;  %740 = vmatprep.subr.mxu1 %v3389_v33 }
  0xb8   : > { %670 = vmatpush1.msra.mxu0 %v3394_v34  ;;  %741 = vmatpush1.msra.mxu1 %v3397_v35 }
  0xb9   : > { %671 = vmatprep.subr.mxu0 %v3402_v36  ;;  %742 = vmatprep.subr.mxu1 %v3405_v37 }
  0xba   : > { %672 = vmatpush1.msra.mxu0 %v3410_v38  ;;  %743 = vmatpush1.msra.mxu1 %v3413_v39 }
  0xbb   : > { %673 = vmatprep.subr.mxu0 %v3418_v40  ;;  %744 = vmatprep.subr.mxu1 %v3421_v41 }
  0xbc   : > { %674 = vmatpush1.msra.mxu0 %v3426_v42  ;;  %745 = vmatpush1.msra.mxu1 %v3429_v43 }
  0xbd   : > { %675 = vmatprep.subr.mxu0 %v3434_v44  ;;  %746 = vmatprep.subr.mxu1 %v3437_v45 }
  0xbe   : > { %676 = vmatpush1.msra.mxu0 %v3442_v46  ;;  %747 = vmatpush1.msra.mxu1 %v3445_v47 }
  0xbf   : > { %677 = vmatprep.subr.mxu0 %v3450_v48  ;;  %748 = vmatprep.subr.mxu1 %v3453_v49 }
  0xc0   : > { %678 = vmatpush1.msra.mxu0 %v3458_v50  ;;  %749 = vmatpush1.msra.mxu1 %v3461_v51 }
  0xc1   : > { %679 = vmatprep.subr.mxu0 %v3466_v52  ;;  %750 = vmatprep.subr.mxu1 %v3469_v53 }
  0xc2   : > { %680 = vmatpush1.msra.mxu0 %v3474_v54  ;;  %751 = vmatpush1.msra.mxu1 %v3477_v55 }
  0xc3   : > { %681 = vmatprep.subr.mxu0 %v3482_v56  ;;  %752 = vmatprep.subr.mxu1 %v3485_v57 }
  0xc4   : > { %682 = vmatpush1.msra.mxu0 %v3490_v58  ;;  %753 = vmatpush1.msra.mxu1 %v3493_v59  ;;  %v4447_v59 = vmov 0.0  }
  0xc5   : > { %683 = vmatprep.subr.mxu0 %v3498_v60  ;;  %754 = vmatprep.subr.mxu1 %v3501_v61 }
  0xc6   : > { %684 = vmatpush1.msra.mxu0 %v3506_v62  ;;  %755 = vmatpush1.msra.mxu1 %v3509_v63 }
  0xc7   : > { %685 = vmatprep.subr.mxu0 %v3514_v0  ;;  %756 = vmatprep.subr.mxu1 %v3517_v1 }
  0xc8   : > { %686 = vmatpush1.msra.mxu0 %v3522_v2  ;;  %719 = vmatprep.mubr.f32.mxu0 %v4447_v59 }
  0xc9   : > { %757 = vmatpush1.msra.mxu1 %v3527_v3  ;;  %790 = vmatprep.mubr.f32.mxu1 %v4447_v59 }
  0xca   : > { %720 = vmatmul.mubr.f32.vlgmr.msra.gmra.mxu0 %v4447_v59  ;;  %791 = vmatmul.mubr.f32.vlgmr.msra.gmra.mxu1 %v4447_v59 }
  0xcb   : > { %862 = vmatprep.subr.mxu0 %v3277_v4  ;;  %933 = vmatprep.subr.mxu1 %v3280_v5 }
  0xcc   : > { %863 = vmatpush1.msra.mxu0 %v3284_v6  ;;  %934 = vmatpush1.msra.mxu1 %v3287_v7 }
  0xcd   : > { %864 = vmatprep.subr.mxu0 %v3290_v8  ;;  %935 = vmatprep.subr.mxu1 %v3293_v9 }
  0xce   : > { %865 = vmatpush1.msra.mxu0 %v3298_v10  ;;  %936 = vmatpush1.msra.mxu1 %v3301_v11 }
  0xcf   : > { %866 = vmatprep.subr.mxu0 %v3306_v12  ;;  %937 = vmatprep.subr.mxu1 %v3309_v13 }
  0xd0   : > { %867 = vmatpush1.msra.mxu0 %v3314_v14  ;;  %938 = vmatpush1.msra.mxu1 %v3317_v15 }
  0xd1   : > { %868 = vmatprep.subr.mxu0 %v3322_v16  ;;  %939 = vmatprep.subr.mxu1 %v3325_v17 }
  0xd2   : > { %869 = vmatpush1.msra.mxu0 %v3330_v18  ;;  %940 = vmatpush1.msra.mxu1 %v3333_v19 }
  0xd3   : > { %870 = vmatprep.subr.mxu0 %v3338_v20  ;;  %941 = vmatprep.subr.mxu1 %v3341_v21 }
  0xd4   : > { %871 = vmatpush1.msra.mxu0 %v3346_v22  ;;  %942 = vmatpush1.msra.mxu1 %v3349_v23 }
  0xd5   : > { %872 = vmatprep.subr.mxu0 %v3354_v24  ;;  %943 = vmatprep.subr.mxu1 %v3357_v25 }
  0xd6   : > { %873 = vmatpush1.msra.mxu0 %v3362_v26  ;;  %944 = vmatpush1.msra.mxu1 %v3365_v27 }
  0xd7   : > { %874 = vmatprep.subr.mxu0 %v3370_v28  ;;  %945 = vmatprep.subr.mxu1 %v3373_v29 }
  0xd8   : > { %875 = vmatpush1.msra.mxu0 %v3378_v30  ;;  %946 = vmatpush1.msra.mxu1 %v3381_v31 }
  0xd9   : > { %876 = vmatprep.subr.mxu0 %v3386_v32  ;;  %947 = vmatprep.subr.mxu1 %v3389_v33 }
  0xda   : > { %877 = vmatpush1.msra.mxu0 %v3394_v34  ;;  %948 = vmatpush1.msra.mxu1 %v3397_v35 }
  0xdb   : > { %878 = vmatprep.subr.mxu0 %v3402_v36  ;;  %949 = vmatprep.subr.mxu1 %v3405_v37 }
  0xdc   : > { %879 = vmatpush1.msra.mxu0 %v3410_v38  ;;  %950 = vmatpush1.msra.mxu1 %v3413_v39 }
  0xdd   : > { %880 = vmatprep.subr.mxu0 %v3418_v40  ;;  %951 = vmatprep.subr.mxu1 %v3421_v41 }
  0xde   : > { %881 = vmatpush1.msra.mxu0 %v3426_v42  ;;  %952 = vmatpush1.msra.mxu1 %v3429_v43 }
  0xdf   : > { %882 = vmatprep.subr.mxu0 %v3434_v44  ;;  %953 = vmatprep.subr.mxu1 %v3437_v45 }
  0xe0   : > { %883 = vmatpush1.msra.mxu0 %v3442_v46  ;;  %954 = vmatpush1.msra.mxu1 %v3445_v47 }
  0xe1   : > { %884 = vmatprep.subr.mxu0 %v3450_v48  ;;  %955 = vmatprep.subr.mxu1 %v3453_v49  ;;  %v4448_v48 = vld [vmem:[#allocation31_spill] sm:$0xff] }
  0xe2   : > { %885 = vmatpush1.msra.mxu0 %v3458_v50  ;;  %956 = vmatpush1.msra.mxu1 %v3461_v51 }
  0xe3   : > { %886 = vmatprep.subr.mxu0 %v3466_v52  ;;  %957 = vmatprep.subr.mxu1 %v3469_v53  ;;  %v2955_v52 = vmov 1966171168  }
  0xe4   : > { %887 = vmatpush1.msra.mxu0 %v3474_v54  ;;  %958 = vmatpush1.msra.mxu1 %v3477_v55  ;;  %v804_v51 = vunpack.c.l.s4 %v2955_v52 }
  0xe5   : > { %888 = vmatprep.subr.mxu0 %v3482_v56  ;;  %959 = vmatprep.subr.mxu1 %v3485_v57 }
  0xe6   : > { %889 = vmatpush1.msra.mxu0 %v3490_v58  ;;  %960 = vmatpush1.msra.mxu1 %v4448_v48  ;;  %v805_v50 = vunpack.c.0.s8 %v804_v51 }
  0xe7   : > { %890 = vmatprep.subr.mxu0 %v3498_v60  ;;  %961 = vmatprep.subr.mxu1 %v3501_v61  ;;  %v421_v61 = vlaneseq }
  0xe8   : > { %891 = vmatpush1.msra.mxu0 %v3506_v62  ;;  %962 = vmatpush1.msra.mxu1 %v3509_v63 }
  0xe9   : > { %892 = vmatprep.subr.mxu0 %v3514_v0  ;;  %963 = vmatprep.subr.mxu1 %v3517_v1  ;;  %v422_v62 = vshrl.u32 %v421_v61, 7  ;;  %v419_v0 = vld [vmem:[%s3203_s11] sm:$0xf] }
  0xea   : > { %893 = vmatpush1.msra.mxu0 %v3522_v2  ;;  %926 = vmatprep.mubr.f32.mxu0 %v4447_v59 }
  0xeb   : > { %964 = vmatpush1.msra.mxu1 %v3527_v3  ;;  %997 = vmatprep.mubr.f32.mxu1 %v4447_v59  ;;  %v3605_v60 = vsub.s32 0, %v422_v62  ;;  %v431_v63 = vsub.s32 2, %v422_v62  ;;  %v427_v48 = vsub.s32 1, %v422_v62  ;;  %v435_v1 = vsub.s32 3, %v422_v62 }
  0xec   : > { %1069 = vmatprep.subr.mxu0 %v3277_v4  ;;  %1140 = vmatprep.subr.mxu1 %v3280_v5 }
  0xed   : > { %4449 = vst [vmem:[#allocation40_spill] sm:$0xff] %v3605_v60  ;;  %v424_v2 = vrot.slane %v419_v0, %v3605_v60  ;;  %v432_v58 = vrot.slane %v419_v0, %v431_v63  ;;  %v428_v57 = vrot.slane %v419_v0, %v427_v48  ;;  %v436_v56 = vrot.slane %v419_v0, %v435_v1 }
  0xee   : > { %v3609_v63 = vsub.s32 %v805_v50, %v422_v62 }
 0x168   : > { %v507_v3 = vpop.f32.mrf.mxu0  ;;  %v578_v55 = vpop.f32.mrf.mxu1 }
 0x169   : > { %v508_v59 = vadd.f32 %v507_v3, %v424_v2  ;;  %v579_v54 = vadd.f32 %v578_v55, %v432_v58 }
 0x16a   : > { %v509_v4 = vpop.f32.mrf.mxu0  ;;  %v580_v53 = vpop.f32.mrf.mxu1 }
 0x16b   : > { %583 = vst [vmem:[#allocation3] sm:$0xff] %v508_v59  ;;  %585 = vst [vmem:[#allocation3 + $0x10] sm:$0xff] %v579_v54  ;;  %v510_v61 = vadd.f32 %v509_v4, %v428_v57  ;;  %v581_v5 = vadd.f32 %v580_v53, %v436_v56 }
 0x16d   : > { %584 = vst [vmem:[#allocation3 + $0x8] sm:$0xff] %v510_v61  ;;  %586 = vst [vmem:[#allocation3 + $0x18] sm:$0xff] %v581_v5 }
 0x174   : > { %v590_v53 = vld [vmem:[#allocation3] ss:$8 sm:$0xf] }
 0x18a   : > { %v721_v49 = vpop.f32.mrf.mxu0  ;;  %v792_v60 = vpop.f32.mrf.mxu1 }
 0x18c   : > { %v723_v48 = vpop.f32.mrf.mxu0  ;;  %v794_v0 = vpop.f32.mrf.mxu1 }
 0x18d   : > { %v801_v1 = vcombine.low %v721_v49, %v723_v48  ;;  %v802_v3 = vcombine.low %v792_v60, %v794_v0 }
 0x18f   : > { %v809_v55 = vrot.slane %v801_v1, %v3609_v63  ;;  %v816_v58 = vrot.slane %v802_v3, %v3609_v63 }
 0x191   : > { %v817_v54 = vcombine.low %v809_v55, %v816_v58 }
 0x193   : > { %v824_v4 = vrot.slane %v817_v54, %v3609_v63 }
 0x195   : > { %v826_v5 = vadd.f32 %v824_v4, %v590_v53 }
 0x197   : > { %v827_v56 = vmul.f32 0.5, %v826_v5  ;;  %v832_v52 = vrot.slane %v826_v5, 1  ;;  %v838_v50 = vrot.slane %v826_v5, 2  ;;  %v841_v57 = vrot.slane %v826_v5, 3 }
 0x199   : > { %2621 = vtanh.f32 %v827_v56  ;;  %v834_v51 = vmul.f32 0.5, %v832_v52  ;;  %v843_v59 = vmul.f32 0.5, %v841_v57  ;;  %v4451_v56 = vld [vmem:[#allocation20_spill] sm:$0xff]  ;;  %v4452_v52 = vld [vmem:[#allocation21_spill] sm:$0xff] }
 0x19a   : > { %v4455_v57 = vld [vmem:[#allocation24_spill] sm:$0xff] }
 0x19b   : > { %2623 = vtanh.f32 %v834_v51  ;;  %v4453_v51 = vld [vmem:[#allocation22_spill] sm:$0xff] }
 0x19c   : > { %2625 = vtanh.f32 %v838_v50  ;;  %v4454_v50 = vld [vmem:[#allocation23_spill] sm:$0xff] }
 0x19d   : > { %2627 = vtanh.f32 %v843_v59  ;;  %v4456_v59 = vld [vmem:[#allocation25_spill] sm:$0xff] }
 0x1a6   : > { %v2622_v49 = vpop.eup %2621 }
 0x1a7   : > { %v829_v60 = vmul.f32 0.5, %v2622_v49  ;;  %v4457_v49 = vld [vmem:[#allocation26_spill] sm:$0xff] }
 0x1a8   : > { %v2624_v62 = vpop.eup %2623 }
 0x1a9   : > { %v830_v2 = vadd.f32 0.5, %v829_v60  ;;  %v836_v61 = vmul.f32 0.5, %v2624_v62  ;;  %v2626_v0 = vpop.eup %2625  ;;  %v4458_v60 = vld [vmem:[#allocation27_spill] sm:$0xff]  ;;  %v4459_v62 = vld [vmem:[#allocation28_spill] sm:$0xff] }
 0x1aa   : > { %v2628_v58 = vpop.eup %2627 }
 0x1ab   : > { %v837_v48 = vadd.f32 0.5, %v836_v61  ;;  %v848_v3 = vmul.f32 %v2626_v0, %v830_v2  ;;  %v845_v54 = vmul.f32 0.5, %v2628_v58  ;;  %v4460_v2 = vld [vmem:[#allocation29_spill] sm:$0xff]  ;;  %v4461_v61 = vld [vmem:[#allocation30_spill] sm:$0xff]  ;;  %v4463_v0 = vld [vmem:[#allocation32_spill] sm:$0xff] }
 0x1ac   : > { %v4466_v58 = vld [vmem:[#allocation35_spill] sm:$0xff] }
 0x1ad   : > { %v847_v1 = vmul.f32 0.0, %v837_v48  ;;  %v846_v4 = vadd.f32 0.5, %v845_v54  ;;  %v4462_v48 = vld [vmem:[#allocation31_spill] sm:$0xff]  ;;  %v4467_v54 = vld [vmem:[#allocation36_spill] sm:$0xff] }
 0x1af   : > { %v3614_v55 = vadd.f32 %v848_v3, %v847_v1  ;;  %v4464_v1 = vld [vmem:[#allocation33_spill] sm:$0xff]  ;;  %v4465_v3 = vld [vmem:[#allocation34_spill] sm:$0xff] }
 0x1b1   : > { %2629 = vtanh.f32 %v3614_v55 }
 0x1be   : > { %v2630_v53 = vpop.eup %2629 }
 0x1bf   : > { %v3617_v5 = vmul.f32 %v2630_v53, %v846_v4  ;;  %v4468_v4 = vld [vmem:[#allocation37_spill] sm:$0xff]  ;;  %v4469_v53 = vld [vmem:[#allocation38_spill] sm:$0xff] }
 0x1c1   : > { %4450 = vst [vmem:[#allocation41_spill] sm:$0xff] %v3617_v5  ;;  %927 = vmatmul.mubr.f32.vlgmr.msra.gmra.mxu0 %v3617_v5  ;;  %998 = vmatmul.mubr.f32.vlgmr.msra.gmra.mxu1 %v3617_v5  ;;  %v4470_v5 = vmov 0.0  }
 0x1c2   : > { %1070 = vmatpush1.msra.mxu0 %v3284_v6  ;;  %1141 = vmatpush1.msra.mxu1 %v3287_v7 }
 0x1c3   : > { %1071 = vmatprep.subr.mxu0 %v3290_v8  ;;  %1142 = vmatprep.subr.mxu1 %v3293_v9 }
 0x1c4   : > { %1072 = vmatpush1.msra.mxu0 %v3298_v10  ;;  %1143 = vmatpush1.msra.mxu1 %v3301_v11 }
 0x1c5   : > { %1073 = vmatprep.subr.mxu0 %v3306_v12  ;;  %1144 = vmatprep.subr.mxu1 %v3309_v13 }
 0x1c6   : > { %1074 = vmatpush1.msra.mxu0 %v3314_v14  ;;  %1145 = vmatpush1.msra.mxu1 %v3317_v15 }
 0x1c7   : > { %1075 = vmatprep.subr.mxu0 %v3322_v16  ;;  %1146 = vmatprep.subr.mxu1 %v3325_v17 }
 0x1c8   : > { %1076 = vmatpush1.msra.mxu0 %v3330_v18  ;;  %1147 = vmatpush1.msra.mxu1 %v3333_v19 }
 0x1c9   : > { %1077 = vmatprep.subr.mxu0 %v3338_v20  ;;  %1148 = vmatprep.subr.mxu1 %v3341_v21 }
 0x1ca   : > { %1078 = vmatpush1.msra.mxu0 %v3346_v22  ;;  %1149 = vmatpush1.msra.mxu1 %v3349_v23 }
 0x1cb   : > { %1079 = vmatprep.subr.mxu0 %v3354_v24  ;;  %1150 = vmatprep.subr.mxu1 %v3357_v25 }
 0x1cc   : > { %1080 = vmatpush1.msra.mxu0 %v3362_v26  ;;  %1151 = vmatpush1.msra.mxu1 %v3365_v27 }
 0x1cd   : > { %1081 = vmatprep.subr.mxu0 %v3370_v28  ;;  %1152 = vmatprep.subr.mxu1 %v3373_v29 }
 0x1ce   : > { %1082 = vmatpush1.msra.mxu0 %v3378_v30  ;;  %1153 = vmatpush1.msra.mxu1 %v3381_v31 }
 0x1cf   : > { %1083 = vmatprep.subr.mxu0 %v3386_v32  ;;  %1154 = vmatprep.subr.mxu1 %v3389_v33 }
 0x1d0   : > { %1084 = vmatpush1.msra.mxu0 %v3394_v34  ;;  %1155 = vmatpush1.msra.mxu1 %v3397_v35 }
 0x1d1   : > { %1085 = vmatprep.subr.mxu0 %v3402_v36  ;;  %1156 = vmatprep.subr.mxu1 %v3405_v37 }
 0x1d2   : > { %1086 = vmatpush1.msra.mxu0 %v3410_v38  ;;  %1157 = vmatpush1.msra.mxu1 %v3413_v39 }
 0x1d3   : > { %1087 = vmatprep.subr.mxu0 %v3418_v40  ;;  %1158 = vmatprep.subr.mxu1 %v3421_v41 }
 0x1d4   : > { %1088 = vmatpush1.msra.mxu0 %v3426_v42  ;;  %1159 = vmatpush1.msra.mxu1 %v3429_v43 }
 0x1d5   : > { %1089 = vmatprep.subr.mxu0 %v3434_v44  ;;  %1160 = vmatprep.subr.mxu1 %v3437_v45 }
 0x1d6   : > { %1090 = vmatpush1.msra.mxu0 %v3442_v46  ;;  %1161 = vmatpush1.msra.mxu1 %v3445_v47 }
 0x1d7   : > { %1091 = vmatprep.subr.mxu0 %v4451_v56  ;;  %1162 = vmatprep.subr.mxu1 %v4452_v52 }
 0x1d8   : > { %1092 = vmatpush1.msra.mxu0 %v4453_v51  ;;  %1163 = vmatpush1.msra.mxu1 %v4454_v50 }
 0x1d9   : > { %1093 = vmatprep.subr.mxu0 %v4455_v57  ;;  %1164 = vmatprep.subr.mxu1 %v4456_v59 }
 0x1da   : > { %1094 = vmatpush1.msra.mxu0 %v4457_v49  ;;  %1165 = vmatpush1.msra.mxu1 %v4458_v60 }
 0x1db   : > { %1095 = vmatprep.subr.mxu0 %v4459_v62  ;;  %1166 = vmatprep.subr.mxu1 %v4460_v2  ;;  %v4471_v2 = vld [vmem:[#allocation39_spill] sm:$0xff] }
 0x1dc   : > { %1096 = vmatpush1.msra.mxu0 %v4461_v61  ;;  %1167 = vmatpush1.msra.mxu1 %v4462_v48  ;;  %v4472_v48 = vld [vmem:[#allocation18_spill] sm:$0xff] }
 0x1dd   : > { %1097 = vmatprep.subr.mxu0 %v4463_v0  ;;  %1168 = vmatprep.subr.mxu1 %v4464_v1  ;;  %v4473_v0 = vld [vmem:[#allocation19_spill] sm:$0xff] }
 0x1de   : > { %1098 = vmatpush1.msra.mxu0 %v4465_v3  ;;  %1169 = vmatpush1.msra.mxu1 %v4466_v58 }
 0x1df   : > { %1099 = vmatprep.subr.mxu0 %v4467_v54  ;;  %1170 = vmatprep.subr.mxu1 %v4468_v4 }
 0x1e0   : > { %1100 = vmatpush1.msra.mxu0 %v4469_v53  ;;  %1133 = vmatprep.mubr.f32.mxu0 %v4470_v5 }
 0x1e1   : > { %1171 = vmatpush1.msra.mxu1 %v4471_v2  ;;  %1204 = vmatprep.mubr.f32.mxu1 %v4470_v5  ;;  %v861_v2 = vld [vmem:[#allocation3 + $0x1] ss:$8 sm:$0xf] }
 0x1e2   : > { %1276 = vmatprep.subr.mxu0 %v4472_v48  ;;  %1347 = vmatprep.subr.mxu1 %v4473_v0 }
 0x281   : > { %v928_v1 = vpop.f32.mrf.mxu0  ;;  %v999_v3 = vpop.f32.mrf.mxu1 }
 0x283   : > { %v930_v61 = vpop.f32.mrf.mxu0  ;;  %v1001_v58 = vpop.f32.mrf.mxu1 }
 0x284   : > { %v1008_v62 = vcombine.low %v928_v1, %v930_v61  ;;  %v1009_v54 = vcombine.low %v999_v3, %v1001_v58 }
 0x286   : > { %v1016_v4 = vrot.slane %v1008_v62, %v3609_v63  ;;  %v1023_v53 = vrot.slane %v1009_v54, %v3609_v63 }
 0x288   : > { %v1024_v60 = vcombine.low %v1016_v4, %v1023_v53  ;;  %v4477_v53 = vld [vmem:[#allocation25_spill] sm:$0xff] }
 0x28a   : > { %v1031_v49 = vrot.slane %v1024_v60, %v3609_v63 }
 0x28c   : > { %v1033_v59 = vadd.f32 %v1031_v49, %v861_v2 }
 0x28e   : > { %v1034_v5 = vmul.f32 0.5, %v1033_v59  ;;  %v1039_v57 = vrot.slane %v1033_v59, 1  ;;  %v1045_v0 = vrot.slane %v1033_v59, 2  ;;  %v1048_v50 = vrot.slane %v1033_v59, 3 }
 0x290   : > { %2631 = vtanh.f32 %v1034_v5  ;;  %v1041_v48 = vmul.f32 0.5, %v1039_v57  ;;  %v1050_v51 = vmul.f32 0.5, %v1048_v50 }
 0x292   : > { %2633 = vtanh.f32 %v1041_v48 }
 0x293   : > { %2635 = vtanh.f32 %v1045_v0  ;;  %v4476_v0 = vld [vmem:[#allocation24_spill] sm:$0xff] }
 0x294   : > { %2637 = vtanh.f32 %v1050_v51  ;;  %v4475_v51 = vld [vmem:[#allocation23_spill] sm:$0xff] }
 0x29d   : > { %v2632_v61 = vpop.eup %2631 }
 0x29e   : > { %v1036_v1 = vmul.f32 0.5, %v2632_v61  ;;  %v4478_v61 = vld [vmem:[#allocation26_spill] sm:$0xff] }
 0x29f   : > { %v2634_v3 = vpop.eup %2633 }
 0x2a0   : > { %v1037_v62 = vadd.f32 0.5, %v1036_v1  ;;  %v1043_v58 = vmul.f32 0.5, %v2634_v3  ;;  %v2636_v4 = vpop.eup %2635  ;;  %v4479_v1 = vld [vmem:[#allocation27_spill] sm:$0xff]  ;;  %v4480_v3 = vld [vmem:[#allocation28_spill] sm:$0xff] }
 0x2a1   : > { %v2638_v5 = vpop.eup %2637 }
 0x2a2   : > { %v1044_v54 = vadd.f32 0.5, %v1043_v58  ;;  %v1055_v49 = vmul.f32 %v2636_v4, %v1037_v62  ;;  %v1052_v57 = vmul.f32 0.5, %v2638_v5  ;;  %v4481_v62 = vld [vmem:[#allocation29_spill] sm:$0xff]  ;;  %v4482_v58 = vld [vmem:[#allocation30_spill] sm:$0xff]  ;;  %v4484_v4 = vld [vmem:[#allocation32_spill] sm:$0xff] }
 0x2a3   : > { %v4487_v5 = vld [vmem:[#allocation35_spill] sm:$0xff] }
 0x2a4   : > { %v1054_v60 = vmul.f32 %v1044_v54, %v3614_v55  ;;  %v1053_v48 = vadd.f32 0.5, %v1052_v57  ;;  %v4474_v55 = vld [vmem:[#allocation22_spill] sm:$0xff]  ;;  %v4483_v54 = vld [vmem:[#allocation31_spill] sm:$0xff]  ;;  %v4488_v57 = vld [vmem:[#allocation36_spill] sm:$0xff] }
 0x2a6   : > { %v3691_v2 = vadd.f32 %v1055_v49, %v1054_v60  ;;  %v4485_v60 = vld [vmem:[#allocation33_spill] sm:$0xff]  ;;  %v4486_v49 = vld [vmem:[#allocation34_spill] sm:$0xff] }
 0x2a8   : > { %2639 = vtanh.f32 %v3691_v2 }
 0x2b5   : > { %v2640_v59 = vpop.eup %2639 }
 0x2b6   : > { %v3694_v50 = vmul.f32 %v2640_v59, %v1053_v48  ;;  %v4489_v48 = vld [vmem:[#allocation37_spill] sm:$0xff]  ;;  %v4490_v59 = vld [vmem:[#allocation38_spill] sm:$0xff] }
 0x2b8   : > { %1134 = vmatmul.mubr.f32.vlgmr.msra.gmra.mxu0 %v3694_v50  ;;  %1205 = vmatmul.mubr.f32.vlgmr.msra.gmra.mxu1 %v3694_v50 }
 0x2b9   : > { %1277 = vmatpush1.msra.mxu0 %v3284_v6  ;;  %1348 = vmatpush1.msra.mxu1 %v3287_v7 }
 0x2ba   : > { %1278 = vmatprep.subr.mxu0 %v3290_v8  ;;  %1349 = vmatprep.subr.mxu1 %v3293_v9 }
 0x2bb   : > { %1279 = vmatpush1.msra.mxu0 %v3298_v10  ;;  %1350 = vmatpush1.msra.mxu1 %v3301_v11 }
 0x2bc   : > { %1280 = vmatprep.subr.mxu0 %v3306_v12  ;;  %1351 = vmatprep.subr.mxu1 %v3309_v13 }
 0x2bd   : > { %1281 = vmatpush1.msra.mxu0 %v3314_v14  ;;  %1352 = vmatpush1.msra.mxu1 %v3317_v15 }
 0x2be   : > { %1282 = vmatprep.subr.mxu0 %v3322_v16  ;;  %1353 = vmatprep.subr.mxu1 %v3325_v17 }
 0x2bf   : > { %1283 = vmatpush1.msra.mxu0 %v3330_v18  ;;  %1354 = vmatpush1.msra.mxu1 %v3333_v19 }
 0x2c0   : > { %1284 = vmatprep.subr.mxu0 %v3338_v20  ;;  %1355 = vmatprep.subr.mxu1 %v3341_v21 }
 0x2c1   : > { %1285 = vmatpush1.msra.mxu0 %v3346_v22  ;;  %1356 = vmatpush1.msra.mxu1 %v3349_v23 }
 0x2c2   : > { %1286 = vmatprep.subr.mxu0 %v3354_v24  ;;  %1357 = vmatprep.subr.mxu1 %v3357_v25 }
 0x2c3   : > { %1287 = vmatpush1.msra.mxu0 %v3362_v26  ;;  %1358 = vmatpush1.msra.mxu1 %v3365_v27 }
 0x2c4   : > { %1288 = vmatprep.subr.mxu0 %v3370_v28  ;;  %1359 = vmatprep.subr.mxu1 %v3373_v29 }
 0x2c5   : > { %1289 = vmatpush1.msra.mxu0 %v3378_v30  ;;  %1360 = vmatpush1.msra.mxu1 %v3381_v31 }
 0x2c6   : > { %1290 = vmatprep.subr.mxu0 %v3386_v32  ;;  %1361 = vmatprep.subr.mxu1 %v3389_v33 }
 0x2c7   : > { %1291 = vmatpush1.msra.mxu0 %v3394_v34  ;;  %1362 = vmatpush1.msra.mxu1 %v3397_v35 }
 0x2c8   : > { %1292 = vmatprep.subr.mxu0 %v3402_v36  ;;  %1363 = vmatprep.subr.mxu1 %v3405_v37 }
 0x2c9   : > { %1293 = vmatpush1.msra.mxu0 %v3410_v38  ;;  %1364 = vmatpush1.msra.mxu1 %v3413_v39 }
 0x2ca   : > { %1294 = vmatprep.subr.mxu0 %v3418_v40  ;;  %1365 = vmatprep.subr.mxu1 %v3421_v41 }
 0x2cb   : > { %1295 = vmatpush1.msra.mxu0 %v3426_v42  ;;  %1366 = vmatpush1.msra.mxu1 %v3429_v43 }
 0x2cc   : > { %1296 = vmatprep.subr.mxu0 %v3434_v44  ;;  %1367 = vmatprep.subr.mxu1 %v3437_v45 }
 0x2cd   : > { %1297 = vmatpush1.msra.mxu0 %v3442_v46  ;;  %1368 = vmatpush1.msra.mxu1 %v3445_v47 }
 0x2ce   : > { %1298 = vmatprep.subr.mxu0 %v4451_v56  ;;  %1369 = vmatprep.subr.mxu1 %v4452_v52 }
 0x2cf   : > { %1299 = vmatpush1.msra.mxu0 %v4474_v55  ;;  %1370 = vmatpush1.msra.mxu1 %v4475_v51 }
 0x2d0   : > { %1300 = vmatprep.subr.mxu0 %v4476_v0  ;;  %1371 = vmatprep.subr.mxu1 %v4477_v53 }
 0x2d1   : > { %1301 = vmatpush1.msra.mxu0 %v4478_v61  ;;  %1372 = vmatpush1.msra.mxu1 %v4479_v1 }
 0x2d2   : > { %1302 = vmatprep.subr.mxu0 %v4480_v3  ;;  %1373 = vmatprep.subr.mxu1 %v4481_v62  ;;  %v4491_v3 = vmov 0.0   ;;  %v4492_v62 = vld [vmem:[#allocation39_spill] sm:$0xff] }
 0x2d3   : > { %1303 = vmatpush1.msra.mxu0 %v4482_v58  ;;  %1374 = vmatpush1.msra.mxu1 %v4483_v54  ;;  %v4493_v54 = vld [vmem:[#allocation18_spill] sm:$0xff] }
 0x2d4   : > { %1304 = vmatprep.subr.mxu0 %v4484_v4  ;;  %1375 = vmatprep.subr.mxu1 %v4485_v60  ;;  %v4494_v4 = vld [vmem:[#allocation19_spill] sm:$0xff] }
 0x2d5   : > { %1305 = vmatpush1.msra.mxu0 %v4486_v49  ;;  %1376 = vmatpush1.msra.mxu1 %v4487_v5 }
 0x2d6   : > { %1306 = vmatprep.subr.mxu0 %v4488_v57  ;;  %1377 = vmatprep.subr.mxu1 %v4489_v48 }
 0x2d7   : > { %1307 = vmatpush1.msra.mxu0 %v4490_v59  ;;  %1340 = vmatprep.mubr.f32.mxu0 %v4491_v3 }
 0x2d8   : > { %1378 = vmatpush1.msra.mxu1 %v4492_v62  ;;  %1411 = vmatprep.mubr.f32.mxu1 %v4491_v3  ;;  %v1068_v62 = vld [vmem:[#allocation3 + $0x2] ss:$8 sm:$0xf] }
 0x2d9   : > { %1483 = vmatprep.subr.mxu0 %v4493_v54  ;;  %1554 = vmatprep.subr.mxu1 %v4494_v4 }
 0x378   : > { %v1135_v60 = vpop.f32.mrf.mxu0  ;;  %v1206_v49 = vpop.f32.mrf.mxu1 }
 0x37a   : > { %v1137_v58 = vpop.f32.mrf.mxu0  ;;  %v1208_v5 = vpop.f32.mrf.mxu1 }
 0x37b   : > { %v1215_v1 = vcombine.low %v1135_v60, %v1137_v58  ;;  %v1216_v57 = vcombine.low %v1206_v49, %v1208_v5 }
 0x37d   : > { %v1223_v48 = vrot.slane %v1215_v1, %v3609_v63  ;;  %v1230_v59 = vrot.slane %v1216_v57, %v3609_v63 }
 0x37f   : > { %v1231_v61 = vcombine.low %v1223_v48, %v1230_v59 }
 0x381   : > { %v1238_v53 = vrot.slane %v1231_v61, %v3609_v63 }
 0x383   : > { %v1240_v0 = vadd.f32 %v1238_v53, %v1068_v62 }
 0x385   : > { %v1241_v3 = vmul.f32 0.5, %v1240_v0  ;;  %v1246_v51 = vrot.slane %v1240_v0, 1  ;;  %v1252_v4 = vrot.slane %v1240_v0, 2  ;;  %v1255_v55 = vrot.slane %v1240_v0, 3 }
 0x387   : > { %2641 = vtanh.f32 %v1241_v3  ;;  %v1248_v54 = vmul.f32 0.5, %v1246_v51  ;;  %v1257_v52 = vmul.f32 0.5, %v1255_v55  ;;  %v4495_v55 = vld [vmem:[#allocation40_spill] sm:$0xff] }
 0x389   : > { %2643 = vtanh.f32 %v1248_v54  ;;  %v2305_v54 = vrot.slane %v3694_v50, %v4495_v55 }
 0x38a   : > { %2645 = vtanh.f32 %v1252_v4 }
 0x38b   : > { %2647 = vtanh.f32 %v1257_v52 }
 0x394   : > { %v2642_v58 = vpop.eup %2641 }
 0x395   : > { %v1243_v60 = vmul.f32 0.5, %v2642_v58 }
 0x396   : > { %v2644_v49 = vpop.eup %2643 }
 0x397   : > { %v1244_v1 = vadd.f32 0.5, %v1243_v60  ;;  %v1250_v5 = vmul.f32 0.5, %v2644_v49  ;;  %v2646_v48 = vpop.eup %2645 }
 0x398   : > { %v2648_v51 = vpop.eup %2647 }
 0x399   : > { %v1251_v57 = vadd.f32 0.5, %v1250_v5  ;;  %v1262_v53 = vmul.f32 %v2646_v48, %v1244_v1  ;;  %v1259_v3 = vmul.f32 0.5, %v2648_v51 }
 0x39b   : > { %v1261_v61 = vmul.f32 %v1251_v57, %v3691_v2  ;;  %v1260_v59 = vadd.f32 0.5, %v1259_v3  ;;  %v4496_v2 = vld [vmem:[#allocation41_spill] sm:$0xff] }
 0x39c   : > { %v2344_v58 = vsel %vm2343_vm0, %v4496_v2, %v2305_v54  ;;  %v3869_v2 = vld [vmem:[%s3201_s9 + $0x1c8] sm:$0xff] }
 0x39d   : > { %v3768_v62 = vadd.f32 %v1262_v53, %v1261_v61 }
 0x39f   : > { %2649 = vtanh.f32 %v3768_v62 }
 0x3ac   : > { %v2650_v0 = vpop.eup %2649 }
 0x3ad   : > { %v1265_v4 = vmul.f32 %v2650_v0, %v1260_v59 }
 0x3af   : > { %1341 = vmatmul.mubr.f32.vlgmr.msra.gmra.mxu0 %v1265_v4  ;;  %v2311_v52 = vrot.slane %v1265_v4, %v4495_v55  ;;  %1412 = vmatmul.mubr.f32.vlgmr.msra.gmra.mxu1 %v1265_v4  ;;  %v3862_v4 = vld [vmem:[%s3201_s9 + $0x1f0] sm:$0xff] }
 0x3b0   : > { %1484 = vmatpush1.msra.mxu0 %v3284_v6  ;;  %1555 = vmatpush1.msra.mxu1 %v3287_v7  ;;  %v4497_v6 = vld [vmem:[#allocation21_spill] sm:$0xff]  ;;  %v4498_v7 = vld [vmem:[#allocation22_spill] sm:$0xff] }
 0x3b1   : > { %v3777_v60 = vsel %vm2345_vm1, %v2344_v58, %v2311_v52  ;;  %1485 = vmatprep.subr.mxu0 %v3290_v8  ;;  %1556 = vmatprep.subr.mxu1 %v3293_v9  ;;  %v4499_v8 = vld [vmem:[#allocation23_spill] sm:$0xff]  ;;  %v4500_v9 = vld [vmem:[#allocation24_spill] sm:$0xff] }
 0x3b2   : > { %1486 = vmatpush1.msra.mxu0 %v3298_v10  ;;  %1557 = vmatpush1.msra.mxu1 %v3301_v11  ;;  %v4501_v10 = vld [vmem:[#allocation25_spill] sm:$0xff]  ;;  %v4502_v11 = vld [vmem:[#allocation26_spill] sm:$0xff]  ;;  %v3873_v58 = vld [vmem:[%s3201_s9 + $0x1d8] sm:$0xff] }
 0x3b3   : > { %1487 = vmatprep.subr.mxu0 %v3306_v12  ;;  %1558 = vmatprep.subr.mxu1 %v3309_v13  ;;  %v4503_v12 = vld [vmem:[#allocation27_spill] sm:$0xff]  ;;  %v4504_v13 = vld [vmem:[#allocation28_spill] sm:$0xff] }
 0x3b4   : > { %1488 = vmatpush1.msra.mxu0 %v3314_v14  ;;  %1559 = vmatpush1.msra.mxu1 %v3317_v15  ;;  %v4505_v14 = vld [vmem:[#allocation29_spill] sm:$0xff]  ;;  %v4506_v15 = vld [vmem:[#allocation30_spill] sm:$0xff] }
 0x3b5   : > { %1489 = vmatprep.subr.mxu0 %v3322_v16  ;;  %1560 = vmatprep.subr.mxu1 %v3325_v17  ;;  %v4507_v16 = vld [vmem:[#allocation31_spill] sm:$0xff]  ;;  %v4508_v17 = vld [vmem:[#allocation32_spill] sm:$0xff] }
 0x3b6   : > { %1490 = vmatpush1.msra.mxu0 %v3330_v18  ;;  %1561 = vmatpush1.msra.mxu1 %v3333_v19  ;;  %v4509_v18 = vld [vmem:[#allocation33_spill] sm:$0xff]  ;;  %v4510_v19 = vld [vmem:[#allocation34_spill] sm:$0xff] }
 0x3b7   : > { %1491 = vmatprep.subr.mxu0 %v3338_v20  ;;  %1562 = vmatprep.subr.mxu1 %v3341_v21  ;;  %v4511_v20 = vld [vmem:[#allocation35_spill] sm:$0xff]  ;;  %v4512_v21 = vld [vmem:[#allocation36_spill] sm:$0xff] }
 0x3b8   : > { %1492 = vmatpush1.msra.mxu0 %v3346_v22  ;;  %1563 = vmatpush1.msra.mxu1 %v3349_v23  ;;  %v4513_v22 = vld [vmem:[#allocation37_spill] sm:$0xff]  ;;  %v4514_v23 = vld [vmem:[#allocation38_spill] sm:$0xff] }
 0x3b9   : > { %1493 = vmatprep.subr.mxu0 %v3354_v24  ;;  %1564 = vmatprep.subr.mxu1 %v3357_v25  ;;  %v4515_v24 = vmov 0.0   ;;  %v4516_v25 = vld [vmem:[#allocation39_spill] sm:$0xff] }
 0x3ba   : > { %1494 = vmatpush1.msra.mxu0 %v3362_v26  ;;  %1565 = vmatpush1.msra.mxu1 %v3365_v27  ;;  %v3842_v26 = vld [vmem:[%s3201_s9 + $0x1e8] sm:$0xff]  ;;  %v3846_v27 = vld [vmem:[%s3201_s9 + $0x1f8] sm:$0xff] }
 0x3bb   : > { %1495 = vmatprep.subr.mxu0 %v3370_v28  ;;  %1566 = vmatprep.subr.mxu1 %v3373_v29  ;;  %4517 = vst [vmem:[#allocation20_spill] sm:$0xff] %v3842_v26  ;;  %4518 = vst [vmem:[#allocation18_spill] sm:$0xff] %v3846_v27 }
 0x3bc   : > { %1496 = vmatpush1.msra.mxu0 %v3378_v30  ;;  %1567 = vmatpush1.msra.mxu1 %v3381_v31 }
 0x3bd   : > { %1497 = vmatprep.subr.mxu0 %v3386_v32  ;;  %1568 = vmatprep.subr.mxu1 %v3389_v33 }
 0x3be   : > { %1498 = vmatpush1.msra.mxu0 %v3394_v34  ;;  %1569 = vmatpush1.msra.mxu1 %v3397_v35 }
 0x3bf   : > { %1499 = vmatprep.subr.mxu0 %v3402_v36  ;;  %1570 = vmatprep.subr.mxu1 %v3405_v37 }
 0x3c0   : > { %1500 = vmatpush1.msra.mxu0 %v3410_v38  ;;  %1571 = vmatpush1.msra.mxu1 %v3413_v39  ;;  %v1275_v38 = vld [vmem:[#allocation3 + $0x3] ss:$8 sm:$0xf] }
 0x3c1   : > { %1501 = vmatprep.subr.mxu0 %v3418_v40  ;;  %1572 = vmatprep.subr.mxu1 %v3421_v41 }
 0x3c2   : > { %1502 = vmatpush1.msra.mxu0 %v3426_v42  ;;  %1573 = vmatpush1.msra.mxu1 %v3429_v43 }
 0x3c3   : > { %1503 = vmatprep.subr.mxu0 %v3434_v44  ;;  %1574 = vmatprep.subr.mxu1 %v3437_v45 }
 0x3c4   : > { %1504 = vmatpush1.msra.mxu0 %v3442_v46  ;;  %1575 = vmatpush1.msra.mxu1 %v3445_v47 }
 0x3c5   : > { %1505 = vmatprep.subr.mxu0 %v4451_v56  ;;  %1576 = vmatprep.subr.mxu1 %v4497_v6  ;;  %v3877_v6 = vld [vmem:[%s3201_s9 + $0x1c0] sm:$0xff] }
 0x3c6   : > { %1506 = vmatpush1.msra.mxu0 %v4498_v7  ;;  %1577 = vmatpush1.msra.mxu1 %v4499_v8  ;;  %v3881_v7 = vld [vmem:[%s3201_s9 + $0x1d0] sm:$0xff]  ;;  %v3889_v8 = vld [vmem:[%s3201_s9 + $0x1b8] sm:$0xff] }
 0x3c7   : > { %1507 = vmatprep.subr.mxu0 %v4500_v9  ;;  %1578 = vmatprep.subr.mxu1 %v4501_v10  ;;  %v3893_v9 = vld [vmem:[%s3201_s9 + $0x1a0] sm:$0xff]  ;;  %v3897_v10 = vld [vmem:[%s3201_s9 + $0x1b0] sm:$0xff] }
 0x3c8   : > { %1508 = vmatpush1.msra.mxu0 %v4502_v11  ;;  %1579 = vmatpush1.msra.mxu1 %v4503_v12  ;;  %v3901_v11 = vld [vmem:[%s3201_s9 + $0x188] sm:$0xff]  ;;  %v3905_v12 = vld [vmem:[%s3201_s9 + $0x198] sm:$0xff] }
 0x3c9   : > { %1509 = vmatprep.subr.mxu0 %v4504_v13  ;;  %1580 = vmatprep.subr.mxu1 %v4505_v14  ;;  %v3909_v13 = vld [vmem:[%s3201_s9 + $0x180] sm:$0xff]  ;;  %v3913_v14 = vld [vmem:[%s3201_s9 + $0x190] sm:$0xff] }
 0x3ca   : > { %1510 = vmatpush1.msra.mxu0 %v4506_v15  ;;  %1581 = vmatpush1.msra.mxu1 %v4507_v16  ;;  %v3917_v15 = vld [vmem:[%s3201_s9 + $0x168] sm:$0xff]  ;;  %v3921_v16 = vld [vmem:[%s3201_s9 + $0x178] sm:$0xff] }
 0x3cb   : > { %1511 = vmatprep.subr.mxu0 %v4508_v17  ;;  %1582 = vmatprep.subr.mxu1 %v4509_v18  ;;  %v3925_v17 = vld [vmem:[%s3201_s9 + $0x160] sm:$0xff]  ;;  %v3929_v18 = vld [vmem:[%s3201_s9 + $0x170] sm:$0xff] }
 0x3cc   : > { %1512 = vmatpush1.msra.mxu0 %v4510_v19  ;;  %1583 = vmatpush1.msra.mxu1 %v4511_v20  ;;  %v3933_v19 = vld [vmem:[%s3201_s9 + $0x148] sm:$0xff]  ;;  %v3937_v20 = vld [vmem:[%s3201_s9 + $0x158] sm:$0xff] }
 0x3cd   : > { %1513 = vmatprep.subr.mxu0 %v4512_v21  ;;  %1584 = vmatprep.subr.mxu1 %v4513_v22  ;;  %v3941_v21 = vld [vmem:[%s3201_s9 + $0x140] sm:$0xff]  ;;  %v3945_v22 = vld [vmem:[%s3201_s9 + $0x150] sm:$0xff] }
 0x3ce   : > { %1514 = vmatpush1.msra.mxu0 %v4514_v23  ;;  %1547 = vmatprep.mubr.f32.mxu0 %v4515_v24  ;;  %v3949_v23 = vld [vmem:[%s3201_s9 + $0x128] sm:$0xff] }
 0x3cf   : > { %1585 = vmatpush1.msra.mxu1 %v4516_v25  ;;  %1618 = vmatprep.mubr.f32.mxu1 %v4515_v24  ;;  %v3953_v25 = vld [vmem:[%s3201_s9 + $0x138] sm:$0xff] }
 0x3d0   : > { %1690 = vmatprep.subr.mxu0 %v3842_v26  ;;  %1761 = vmatprep.subr.mxu1 %v3846_v27 }
 0x46f   : > { %v1342_v28 = vpop.f32.mrf.mxu0  ;;  %v1413_v29 = vpop.f32.mrf.mxu1 }
 0x471   : > { %v1344_v30 = vpop.f32.mrf.mxu0  ;;  %v1415_v31 = vpop.f32.mrf.mxu1 }
 0x472   : > { %v1422_v32 = vcombine.low %v1342_v28, %v1344_v30  ;;  %v1423_v33 = vcombine.low %v1413_v29, %v1415_v31  ;;  %v3957_v28 = vld [vmem:[%s3201_s9 + $0x120] sm:$0xff]  ;;  %v3961_v29 = vld [vmem:[%s3201_s9 + $0x130] sm:$0xff]  ;;  %v3965_v30 = vld [vmem:[%s3201_s9 + $0x108] sm:$0xff] }
 0x473   : > { %v3969_v31 = vld [vmem:[%s3201_s9 + $0x118] sm:$0xff] }
 0x474   : > { %v1430_v34 = vrot.slane %v1422_v32, %v3609_v63  ;;  %v1437_v35 = vrot.slane %v1423_v33, %v3609_v63  ;;  %v3973_v32 = vld [vmem:[%s3201_s9 + $0x100] sm:$0xff]  ;;  %v3977_v33 = vld [vmem:[%s3201_s9 + $0x110] sm:$0xff] }
 0x476   : > { %v1438_v36 = vcombine.low %v1430_v34, %v1437_v35  ;;  %v3981_v34 = vld [vmem:[%s3201_s9 + $0xe8] sm:$0xff]  ;;  %v3985_v35 = vld [vmem:[%s3201_s9 + $0xf8] sm:$0xff] }
 0x478   : > { %v1445_v37 = vrot.slane %v1438_v36, %v3609_v63  ;;  %v3989_v36 = vld [vmem:[%s3201_s9 + $0xe0] sm:$0xff] }
 0x47a   : > { %v1447_v39 = vadd.f32 %v1445_v37, %v1275_v38  ;;  %v3993_v37 = vld [vmem:[%s3201_s9 + $0xf0] sm:$0xff]  ;;  %v3997_v38 = vld [vmem:[%s3201_s9 + $0xc8] sm:$0xff] }
 0x47c   : > { %v1448_v40 = vmul.f32 0.5, %v1447_v39  ;;  %v1453_v41 = vrot.slane %v1447_v39, 1  ;;  %v1459_v43 = vrot.slane %v1447_v39, 2  ;;  %v1462_v44 = vrot.slane %v1447_v39, 3  ;;  %v4001_v39 = vld [vmem:[%s3201_s9 + $0xd8] sm:$0xff] }
 0x47e   : > { %2651 = vtanh.f32 %v1448_v40  ;;  %v1455_v42 = vmul.f32 0.5, %v1453_v41  ;;  %v1464_v45 = vmul.f32 0.5, %v1462_v44  ;;  %v4005_v40 = vld [vmem:[%s3201_s9 + $0xc0] sm:$0xff]  ;;  %v4009_v41 = vld [vmem:[%s3201_s9 + $0xd0] sm:$0xff] }
 0x47f   : > { %v4021_v44 = vld [vmem:[%s3201_s9 + $0xa0] sm:$0xff] }
 0x480   : > { %2653 = vtanh.f32 %v1455_v42  ;;  %v4013_v42 = vld [vmem:[%s3201_s9 + $0xa8] sm:$0xff] }
 0x481   : > { %2655 = vtanh.f32 %v1459_v43  ;;  %v4017_v43 = vld [vmem:[%s3201_s9 + $0xb8] sm:$0xff] }
 0x482   : > { %2657 = vtanh.f32 %v1464_v45  ;;  %v4025_v45 = vld [vmem:[%s3201_s9 + $0xb0] sm:$0xff] }
 0x48b   : > { %v2652_v46 = vpop.eup %2651 }
 0x48c   : > { %v1450_v47 = vmul.f32 0.5, %v2652_v46  ;;  %v4029_v46 = vld [vmem:[%s3201_s9 + $0x88] sm:$0xff] }
 0x48d   : > { %v2654_v56 = vpop.eup %2653  ;;  %4519 = vst [vmem:[#allocation19_spill] sm:$0xff] %v4029_v46 }
 0x48e   : > { %v1451_v50 = vadd.f32 0.5, %v1450_v47  ;;  %v1457_v49 = vmul.f32 0.5, %v2654_v56  ;;  %v2656_v5 = vpop.eup %2655  ;;  %v4033_v47 = vld [vmem:[%s3201_s9 + $0x98] sm:$0xff]  ;;  %v4037_v56 = vld [vmem:[%s3201_s9 + $0x80] sm:$0xff] }
 0x48f   : > { %v2658_v53 = vpop.eup %2657  ;;  %4520 = vst [vmem:[#allocation40_spill] sm:$0xff] %v4033_v47  ;;  %4521 = vst [vmem:[#allocation41_spill] sm:$0xff] %v4037_v56 }
 0x490   : > { %v1458_v1 = vadd.f32 0.5, %v1457_v49  ;;  %v1469_v48 = vmul.f32 %v2656_v5, %v1451_v50  ;;  %v1466_v51 = vmul.f32 0.5, %v2658_v53  ;;  %v4041_v50 = vld [vmem:[%s3201_s9 + $0x90] sm:$0xff]  ;;  %v4045_v49 = vld [vmem:[%s3201_s9 + $0x68] sm:$0xff]  ;;  %v4053_v5 = vld [vmem:[%s3201_s9 + $0x60] sm:$0xff] }
 0x491   : > { %4522 = vst [vmem:[#allocation21_spill] sm:$0xff] %v4041_v50  ;;  %4523 = vst [vmem:[#allocation22_spill] sm:$0xff] %v4045_v49  ;;  %v4065_v53 = vld [vmem:[%s3201_s9 + $0x58] sm:$0xff] }
 0x492   : > { %v1468_v57 = vmul.f32 %v1458_v1, %v3768_v62  ;;  %v1467_v3 = vadd.f32 0.5, %v1466_v51  ;;  %v3858_v62 = vld [vmem:[%s3201_s9 + $0x1e0] sm:$0xff]  ;;  %v4049_v1 = vld [vmem:[%s3201_s9 + $0x78] sm:$0xff]  ;;  %4525 = vst [vmem:[#allocation24_spill] sm:$0xff] %v4053_v5  ;;  %4528 = vst [vmem:[#allocation27_spill] sm:$0xff] %v4065_v53 }
 0x493   : > { %4524 = vst [vmem:[#allocation23_spill] sm:$0xff] %v4049_v1  ;;  %v4069_v51 = vld [vmem:[%s3201_s9 + $0x40] sm:$0xff] }
 0x494   : > { %v3853_v61 = vadd.f32 %v1469_v48, %v1468_v57  ;;  %v4057_v57 = vld [vmem:[%s3201_s9 + $0x70] sm:$0xff]  ;;  %v4061_v48 = vld [vmem:[%s3201_s9 + $0x48] sm:$0xff]  ;;  %4529 = vst [vmem:[#allocation28_spill] sm:$0xff] %v4069_v51 }
 0x495   : > { %4526 = vst [vmem:[#allocation25_spill] sm:$0xff] %v4057_v57  ;;  %4527 = vst [vmem:[#allocation26_spill] sm:$0xff] %v4061_v48 }
 0x496   : > { %2659 = vtanh.f32 %v3853_v61 }
 0x4a3   : > { %v2660_v59 = vpop.eup %2659 }
 0x4a4   : > { %v1472_v0 = vmul.f32 %v2660_v59, %v1467_v3  ;;  %v4073_v3 = vld [vmem:[%s3201_s9 + $0x50] sm:$0xff]  ;;  %v4077_v59 = vld [vmem:[%s3201_s9 + $0x28] sm:$0xff] }
 0x4a5   : > { %4530 = vst [vmem:[#allocation29_spill] sm:$0xff] %v4073_v3  ;;  %4531 = vst [vmem:[#allocation30_spill] sm:$0xff] %v4077_v59 }
 0x4a6   : > { %1548 = vmatmul.mubr.f32.vlgmr.msra.gmra.mxu0 %v1472_v0  ;;  %v2317_v54 = vrot.slane %v1472_v0, %v4495_v55  ;;  %1619 = vmatmul.mubr.f32.vlgmr.msra.gmra.mxu1 %v1472_v0  ;;  %v4081_v0 = vld [vmem:[%s3201_s9 + $0x38] sm:$0xff] }
 0x4a7   : > { %1691 = vmatpush1.msra.mxu0 %v3858_v62  ;;  %1762 = vmatpush1.msra.mxu1 %v3862_v4  ;;  %4532 = vst [vmem:[#allocation31_spill] sm:$0xff] %v4081_v0 }
 0x4a8   : > { %v3866_v52 = vsel %vm2347_vm2, %v3777_v60, %v2317_v54  ;;  %1692 = vmatprep.subr.mxu0 %v3869_v2  ;;  %1763 = vmatprep.subr.mxu1 %v3873_v58  ;;  %v3885_v60 = vld [vmem:[%s3201_s9 + $0x1a8] sm:$0xff]  ;;  %v4085_v54 = vld [vmem:[%s3201_s9 + $0x20] sm:$0xff] }
 0x4a9   : > { %1693 = vmatpush1.msra.mxu0 %v3877_v6  ;;  %1764 = vmatpush1.msra.mxu1 %v3881_v7  ;;  %4533 = vst [vmem:[#allocation32_spill] sm:$0xff] %v4085_v54 }
 0x4aa   : > { %1694 = vmatprep.subr.mxu0 %v3885_v60  ;;  %1765 = vmatprep.subr.mxu1 %v3889_v8 }
 0x4ab   : > { %1695 = vmatpush1.msra.mxu0 %v3893_v9  ;;  %1766 = vmatpush1.msra.mxu1 %v3897_v10 }
 0x4ac   : > { %1696 = vmatprep.subr.mxu0 %v3901_v11  ;;  %1767 = vmatprep.subr.mxu1 %v3905_v12 }
 0x4ad   : > { %1697 = vmatpush1.msra.mxu0 %v3909_v13  ;;  %1768 = vmatpush1.msra.mxu1 %v3913_v14 }
 0x4ae   : > { %1698 = vmatprep.subr.mxu0 %v3917_v15  ;;  %1769 = vmatprep.subr.mxu1 %v3921_v16 }
 0x4af   : > { %1699 = vmatpush1.msra.mxu0 %v3925_v17  ;;  %1770 = vmatpush1.msra.mxu1 %v3929_v18 }
 0x4b0   : > { %1700 = vmatprep.subr.mxu0 %v3933_v19  ;;  %1771 = vmatprep.subr.mxu1 %v3937_v20 }
 0x4b1   : > { %1701 = vmatpush1.msra.mxu0 %v3941_v21  ;;  %1772 = vmatpush1.msra.mxu1 %v3945_v22 }
 0x4b2   : > { %1702 = vmatprep.subr.mxu0 %v3949_v23  ;;  %1773 = vmatprep.subr.mxu1 %v3953_v25 }
 0x4b3   : > { %1703 = vmatpush1.msra.mxu0 %v3957_v28  ;;  %1774 = vmatpush1.msra.mxu1 %v3961_v29 }
 0x4b4   : > { %1704 = vmatprep.subr.mxu0 %v3965_v30  ;;  %1775 = vmatprep.subr.mxu1 %v3969_v31 }
 0x4b5   : > { %1705 = vmatpush1.msra.mxu0 %v3973_v32  ;;  %1776 = vmatpush1.msra.mxu1 %v3977_v33 }
 0x4b6   : > { %1706 = vmatprep.subr.mxu0 %v3981_v34  ;;  %1777 = vmatprep.subr.mxu1 %v3985_v35 }
 0x4b7   : > { %1707 = vmatpush1.msra.mxu0 %v3989_v36  ;;  %1778 = vmatpush1.msra.mxu1 %v3993_v37 }
 0x4b8   : > { %1708 = vmatprep.subr.mxu0 %v3997_v38  ;;  %1779 = vmatprep.subr.mxu1 %v4001_v39 }
 0x4b9   : > { %1709 = vmatpush1.msra.mxu0 %v4005_v40  ;;  %1780 = vmatpush1.msra.mxu1 %v4009_v41 }
 0x4ba   : > { %1710 = vmatprep.subr.mxu0 %v4013_v42  ;;  %1781 = vmatprep.subr.mxu1 %v4017_v43 }
 0x4bb   : > { %1711 = vmatpush1.msra.mxu0 %v4021_v44  ;;  %1782 = vmatpush1.msra.mxu1 %v4025_v45 }
 0x4bc   : > { %1712 = vmatprep.subr.mxu0 %v4029_v46  ;;  %1783 = vmatprep.subr.mxu1 %v4033_v47 }
 0x4bd   : > { %1713 = vmatpush1.msra.mxu0 %v4037_v56  ;;  %1784 = vmatpush1.msra.mxu1 %v4041_v50 }
 0x4be   : > { %1714 = vmatprep.subr.mxu0 %v4045_v49  ;;  %1785 = vmatprep.subr.mxu1 %v4049_v1 }
 0x4bf   : > { %1715 = vmatpush1.msra.mxu0 %v4053_v5  ;;  %1786 = vmatpush1.msra.mxu1 %v4057_v57 }
 0x4c0   : > { %1716 = vmatprep.subr.mxu0 %v4061_v48  ;;  %1787 = vmatprep.subr.mxu1 %v4065_v53  ;;  %v4089_v53 = vld [vmem:[%s3201_s9 + $0x30] sm:$0xff] }
 0x4c1   : > { %1717 = vmatpush1.msra.mxu0 %v4069_v51  ;;  %1788 = vmatpush1.msra.mxu1 %v4073_v3  ;;  %4534 = vst [vmem:[#allocation33_spill] sm:$0xff] %v4089_v53  ;;  %v4093_v51 = vld [vmem:[%s3201_s9 + $0x8] sm:$0xff]  ;;  %v4097_v3 = vld [vmem:[%s3201_s9 + $0x18] sm:$0xff] }
 0x4c2   : > { %1718 = vmatprep.subr.mxu0 %v4077_v59  ;;  %1789 = vmatprep.subr.mxu1 %v4081_v0  ;;  %4535 = vst [vmem:[#allocation34_spill] sm:$0xff] %v4093_v51  ;;  %4536 = vst [vmem:[#allocation35_spill] sm:$0xff] %v4097_v3  ;;  %v4101_v59 = vld [vmem:[%s3201_s9] sm:$0xff]  ;;  %v4106_v0 = vld [vmem:[%s3201_s9 + $0x10] sm:$0xff] }
 0x4c3   : > { %1719 = vmatpush1.msra.mxu0 %v4085_v54  ;;  %1790 = vmatpush1.msra.mxu1 %v4089_v53  ;;  %4537 = vst [vmem:[#allocation36_spill] sm:$0xff] %v4101_v59  ;;  %4538 = vst [vmem:[#allocation37_spill] sm:$0xff] %v4106_v0 }
 0x4c4   : > { %1720 = vmatprep.subr.mxu0 %v4093_v51  ;;  %1791 = vmatprep.subr.mxu1 %v4097_v3 }
 0x4c5   : > { %1721 = vmatpush1.msra.mxu0 %v4101_v59  ;;  %1754 = vmatprep.mubr.f32.mxu0 %v4515_v24 }
 0x4c6   : > { %1792 = vmatpush1.msra.mxu1 %v4106_v0  ;;  %1825 = vmatprep.mubr.f32.mxu1 %v4515_v24  ;;  %v1482_v0 = vld [vmem:[#allocation3 + $0x4] ss:$8 sm:$0xf] }
 0x4c7   : > { %1897 = vmatprep.subr.mxu0 %v3842_v26  ;;  %1968 = vmatprep.subr.mxu1 %v3846_v27 }
 0x566   : > { %v1549_v51 = vpop.f32.mrf.mxu0  ;;  %v1620_v53 = vpop.f32.mrf.mxu1 }
 0x568   : > { %v1551_v54 = vpop.f32.mrf.mxu0  ;;  %v1622_v3 = vpop.f32.mrf.mxu1 }
 0x569   : > { %v1629_v48 = vcombine.low %v1549_v51, %v1551_v54  ;;  %v1630_v57 = vcombine.low %v1620_v53, %v1622_v3 }
 0x56b   : > { %v1637_v59 = vrot.slane %v1629_v48, %v3609_v63  ;;  %v1644_v5 = vrot.slane %v1630_v57, %v3609_v63 }
 0x56d   : > { %v1645_v1 = vcombine.low %v1637_v59, %v1644_v5 }
 0x56f   : > { %v1652_v49 = vrot.slane %v1645_v1, %v3609_v63 }
 0x571   : > { %v1654_v50 = vadd.f32 %v1652_v49, %v1482_v0  ;;  %v4541_v0 = vld [vmem:[#allocation41_spill] sm:$0xff] }
 0x573   : > { %v1655_v24 = vmul.f32 0.5, %v1654_v50  ;;  %v1660_v56 = vrot.slane %v1654_v50, 1  ;;  %v1666_v27 = vrot.slane %v1654_v50, 2  ;;  %v1669_v47 = vrot.slane %v1654_v50, 3 }
 0x575   : > { %2661 = vtanh.f32 %v1655_v24  ;;  %v1662_v26 = vmul.f32 0.5, %v1660_v56  ;;  %v1671_v46 = vmul.f32 0.5, %v1669_v47 }
 0x577   : > { %2663 = vtanh.f32 %v1662_v26 }
 0x578   : > { %2665 = vtanh.f32 %v1666_v27 }
 0x579   : > { %2667 = vtanh.f32 %v1671_v46  ;;  %v4540_v46 = vld [vmem:[#allocation40_spill] sm:$0xff] }
 0x582   : > { %v2662_v51 = vpop.eup %2661 }
 0x583   : > { %v1657_v53 = vmul.f32 0.5, %v2662_v51  ;;  %v4542_v51 = vld [vmem:[#allocation21_spill] sm:$0xff] }
 0x584   : > { %v2664_v3 = vpop.eup %2663 }
 0x585   : > { %v1658_v48 = vadd.f32 0.5, %v1657_v53  ;;  %v1664_v54 = vmul.f32 0.5, %v2664_v3  ;;  %v2666_v57 = vpop.eup %2665  ;;  %v4543_v53 = vld [vmem:[#allocation22_spill] sm:$0xff]  ;;  %v4544_v3 = vld [vmem:[#allocation23_spill] sm:$0xff] }
 0x586   : > { %v2668_v24 = vpop.eup %2667 }
 0x587   : > { %v1665_v5 = vadd.f32 0.5, %v1664_v54  ;;  %v1676_v49 = vmul.f32 %v2666_v57, %v1658_v48  ;;  %v1673_v26 = vmul.f32 0.5, %v2668_v24  ;;  %v4545_v48 = vld [vmem:[#allocation24_spill] sm:$0xff]  ;;  %v4546_v54 = vld [vmem:[#allocation25_spill] sm:$0xff]  ;;  %v4548_v57 = vld [vmem:[#allocation27_spill] sm:$0xff] }
 0x588   : > { %v4551_v24 = vld [vmem:[#allocation30_spill] sm:$0xff] }
 0x589   : > { %v1675_v1 = vmul.f32 %v1665_v5, %v3853_v61  ;;  %v1674_v27 = vadd.f32 0.5, %v1673_v26  ;;  %v4547_v5 = vld [vmem:[#allocation26_spill] sm:$0xff]  ;;  %v4552_v26 = vld [vmem:[#allocation31_spill] sm:$0xff] }
 0x58b   : > { %v4116_v59 = vadd.f32 %v1676_v49, %v1675_v1  ;;  %v4549_v1 = vld [vmem:[#allocation28_spill] sm:$0xff]  ;;  %v4550_v49 = vld [vmem:[#allocation29_spill] sm:$0xff] }
 0x58d   : > { %2669 = vtanh.f32 %v4116_v59 }
 0x59a   : > { %v2670_v56 = vpop.eup %2669 }
 0x59b   : > { %v1679_v47 = vmul.f32 %v2670_v56, %v1674_v27  ;;  %v4553_v27 = vld [vmem:[#allocation32_spill] sm:$0xff]  ;;  %v4554_v56 = vld [vmem:[#allocation33_spill] sm:$0xff] }
 0x59d   : > { %1755 = vmatmul.mubr.f32.vlgmr.msra.gmra.mxu0 %v1679_v47  ;;  %v2323_v50 = vrot.slane %v1679_v47, %v4495_v55  ;;  %1826 = vmatmul.mubr.f32.vlgmr.msra.gmra.mxu1 %v1679_v47  ;;  %v4555_v47 = vld [vmem:[#allocation34_spill] sm:$0xff] }
 0x59e   : > { %1898 = vmatpush1.msra.mxu0 %v3858_v62  ;;  %1969 = vmatpush1.msra.mxu1 %v3862_v4 }
 0x59f   : > { %v4123_v61 = vsel %vm2349_vm3, %v3866_v52, %v2323_v50  ;;  %1899 = vmatprep.subr.mxu0 %v3869_v2  ;;  %1970 = vmatprep.subr.mxu1 %v3873_v58  ;;  %v4539_v52 = vld [vmem:[#allocation19_spill] sm:$0xff] }
 0x5a0   : > { %1900 = vmatpush1.msra.mxu0 %v3877_v6  ;;  %1971 = vmatpush1.msra.mxu1 %v3881_v7  ;;  %v4556_v50 = vld [vmem:[#allocation35_spill] sm:$0xff] }
 0x5a1   : > { %1901 = vmatprep.subr.mxu0 %v3885_v60  ;;  %1972 = vmatprep.subr.mxu1 %v3889_v8 }
 0x5a2   : > { %1902 = vmatpush1.msra.mxu0 %v3893_v9  ;;  %1973 = vmatpush1.msra.mxu1 %v3897_v10 }
 0x5a3   : > { %1903 = vmatprep.subr.mxu0 %v3901_v11  ;;  %1974 = vmatprep.subr.mxu1 %v3905_v12 }
 0x5a4   : > { %1904 = vmatpush1.msra.mxu0 %v3909_v13  ;;  %1975 = vmatpush1.msra.mxu1 %v3913_v14 }
 0x5a5   : > { %1905 = vmatprep.subr.mxu0 %v3917_v15  ;;  %1976 = vmatprep.subr.mxu1 %v3921_v16 }
 0x5a6   : > { %1906 = vmatpush1.msra.mxu0 %v3925_v17  ;;  %1977 = vmatpush1.msra.mxu1 %v3929_v18 }
 0x5a7   : > { %1907 = vmatprep.subr.mxu0 %v3933_v19  ;;  %1978 = vmatprep.subr.mxu1 %v3937_v20 }
 0x5a8   : > { %1908 = vmatpush1.msra.mxu0 %v3941_v21  ;;  %1979 = vmatpush1.msra.mxu1 %v3945_v22 }
 0x5a9   : > { %1909 = vmatprep.subr.mxu0 %v3949_v23  ;;  %1980 = vmatprep.subr.mxu1 %v3953_v25 }
 0x5aa   : > { %1910 = vmatpush1.msra.mxu0 %v3957_v28  ;;  %1981 = vmatpush1.msra.mxu1 %v3961_v29 }
 0x5ab   : > { %1911 = vmatprep.subr.mxu0 %v3965_v30  ;;  %1982 = vmatprep.subr.mxu1 %v3969_v31 }
 0x5ac   : > { %1912 = vmatpush1.msra.mxu0 %v3973_v32  ;;  %1983 = vmatpush1.msra.mxu1 %v3977_v33 }
 0x5ad   : > { %1913 = vmatprep.subr.mxu0 %v3981_v34  ;;  %1984 = vmatprep.subr.mxu1 %v3985_v35 }
 0x5ae   : > { %1914 = vmatpush1.msra.mxu0 %v3989_v36  ;;  %1985 = vmatpush1.msra.mxu1 %v3993_v37 }
 0x5af   : > { %1915 = vmatprep.subr.mxu0 %v3997_v38  ;;  %1986 = vmatprep.subr.mxu1 %v4001_v39 }
 0x5b0   : > { %1916 = vmatpush1.msra.mxu0 %v4005_v40  ;;  %1987 = vmatpush1.msra.mxu1 %v4009_v41 }
 0x5b1   : > { %1917 = vmatprep.subr.mxu0 %v4013_v42  ;;  %1988 = vmatprep.subr.mxu1 %v4017_v43 }
 0x5b2   : > { %1918 = vmatpush1.msra.mxu0 %v4021_v44  ;;  %1989 = vmatpush1.msra.mxu1 %v4025_v45 }
 0x5b3   : > { %1919 = vmatprep.subr.mxu0 %v4539_v52  ;;  %1990 = vmatprep.subr.mxu1 %v4540_v46 }
 0x5b4   : > { %1920 = vmatpush1.msra.mxu0 %v4541_v0  ;;  %1991 = vmatpush1.msra.mxu1 %v4542_v51 }
 0x5b5   : > { %1921 = vmatprep.subr.mxu0 %v4543_v53  ;;  %1992 = vmatprep.subr.mxu1 %v4544_v3 }
 0x5b6   : > { %1922 = vmatpush1.msra.mxu0 %v4545_v48  ;;  %1993 = vmatpush1.msra.mxu1 %v4546_v54  ;;  %v4557_v54 = vld [vmem:[#allocation36_spill] sm:$0xff] }
 0x5b7   : > { %1923 = vmatprep.subr.mxu0 %v4547_v5  ;;  %1994 = vmatprep.subr.mxu1 %v4548_v57  ;;  %v4558_v5 = vmov 0.0   ;;  %v4559_v57 = vld [vmem:[#allocation37_spill] sm:$0xff] }
 0x5b8   : > { %1924 = vmatpush1.msra.mxu0 %v4549_v1  ;;  %1995 = vmatpush1.msra.mxu1 %v4550_v49  ;;  %v4560_v49 = vld [vmem:[#allocation20_spill] sm:$0xff] }
 0x5b9   : > { %1925 = vmatprep.subr.mxu0 %v4551_v24  ;;  %1996 = vmatprep.subr.mxu1 %v4552_v26  ;;  %v4561_v24 = vld [vmem:[#allocation18_spill] sm:$0xff] }
 0x5ba   : > { %1926 = vmatpush1.msra.mxu0 %v4553_v27  ;;  %1997 = vmatpush1.msra.mxu1 %v4554_v56 }
 0x5bb   : > { %1927 = vmatprep.subr.mxu0 %v4555_v47  ;;  %1998 = vmatprep.subr.mxu1 %v4556_v50 }
 0x5bc   : > { %1928 = vmatpush1.msra.mxu0 %v4557_v54  ;;  %1961 = vmatprep.mubr.f32.mxu0 %v4558_v5 }
 0x5bd   : > { %1999 = vmatpush1.msra.mxu1 %v4559_v57  ;;  %2032 = vmatprep.mubr.f32.mxu1 %v4558_v5  ;;  %v1689_v57 = vld [vmem:[#allocation3 + $0x5] ss:$8 sm:$0xf] }
 0x5be   : > { %2104 = vmatprep.subr.mxu0 %v4560_v49  ;;  %2175 = vmatprep.subr.mxu1 %v4561_v24 }
 0x65d   : > { %v1756_v26 = vpop.f32.mrf.mxu0  ;;  %v1827_v27 = vpop.f32.mrf.mxu1 }
 0x65f   : > { %v1758_v1 = vpop.f32.mrf.mxu0  ;;  %v1829_v56 = vpop.f32.mrf.mxu1 }
 0x660   : > { %v1836_v48 = vcombine.low %v1756_v26, %v1758_v1  ;;  %v1837_v47 = vcombine.low %v1827_v27, %v1829_v56 }
 0x662   : > { %v1844_v50 = vrot.slane %v1836_v48, %v3609_v63  ;;  %v1851_v54 = vrot.slane %v1837_v47, %v3609_v63 }
 0x664   : > { %v1852_v3 = vcombine.low %v1844_v50, %v1851_v54 }
 0x666   : > { %v1859_v53 = vrot.slane %v1852_v3, %v3609_v63 }
 0x668   : > { %v1861_v51 = vadd.f32 %v1859_v53, %v1689_v57 }
 0x66a   : > { %v1862_v5 = vmul.f32 0.5, %v1861_v51  ;;  %v1867_v0 = vrot.slane %v1861_v51, 1  ;;  %v1873_v24 = vrot.slane %v1861_v51, 2  ;;  %v1876_v46 = vrot.slane %v1861_v51, 3 }
 0x66c   : > { %2671 = vtanh.f32 %v1862_v5  ;;  %v1869_v49 = vmul.f32 0.5, %v1867_v0  ;;  %v1878_v52 = vmul.f32 0.5, %v1876_v46 }
 0x66e   : > { %2673 = vtanh.f32 %v1869_v49 }
 0x66f   : > { %2675 = vtanh.f32 %v1873_v24 }
 0x670   : > { %2677 = vtanh.f32 %v1878_v52 }
 0x679   : > { %v2672_v1 = vpop.eup %2671 }
 0x67a   : > { %v1864_v26 = vmul.f32 0.5, %v2672_v1 }
 0x67b   : > { %v2674_v27 = vpop.eup %2673 }
 0x67c   : > { %v1865_v48 = vadd.f32 0.5, %v1864_v26  ;;  %v1871_v56 = vmul.f32 0.5, %v2674_v27  ;;  %v2676_v47 = vpop.eup %2675 }
 0x67d   : > { %v2678_v0 = vpop.eup %2677 }
 0x67e   : > { %v1872_v54 = vadd.f32 0.5, %v1871_v56  ;;  %v1883_v53 = vmul.f32 %v2676_v47, %v1865_v48  ;;  %v1880_v5 = vmul.f32 0.5, %v2678_v0 }
 0x680   : > { %v1882_v3 = vmul.f32 %v1872_v54, %v4116_v59  ;;  %v1881_v50 = vadd.f32 0.5, %v1880_v5 }
 0x682   : > { %v4193_v57 = vadd.f32 %v1883_v53, %v1882_v3 }
 0x684   : > { %2679 = vtanh.f32 %v4193_v57 }
 0x691   : > { %v2680_v51 = vpop.eup %2679 }
 0x692   : > { %v1886_v46 = vmul.f32 %v2680_v51, %v1881_v50 }
 0x694   : > { %1962 = vmatmul.mubr.f32.vlgmr.msra.gmra.mxu0 %v1886_v46  ;;  %v2329_v49 = vrot.slane %v1886_v46, %v4495_v55  ;;  %2033 = vmatmul.mubr.f32.vlgmr.msra.gmra.mxu1 %v1886_v46 }
 0x695   : > { %2105 = vmatpush1.msra.mxu0 %v3858_v62  ;;  %2176 = vmatpush1.msra.mxu1 %v3862_v4  ;;  %v4562_v62 = vld [vmem:[#allocation19_spill] sm:$0xff]  ;;  %v4563_v4 = vld [vmem:[#allocation40_spill] sm:$0xff] }
 0x696   : > { %v4200_v59 = vsel %vm2351_vm4, %v4123_v61, %v2329_v49  ;;  %2106 = vmatprep.subr.mxu0 %v3869_v2  ;;  %2177 = vmatprep.subr.mxu1 %v3873_v58  ;;  %v4564_v2 = vld [vmem:[#allocation41_spill] sm:$0xff] }
 0x697   : > { %2107 = vmatpush1.msra.mxu0 %v3877_v6  ;;  %2178 = vmatpush1.msra.mxu1 %v3881_v7  ;;  %v4565_v58 = vld [vmem:[#allocation21_spill] sm:$0xff]  ;;  %v4566_v6 = vld [vmem:[#allocation22_spill] sm:$0xff]  ;;  %v4567_v7 = vld [vmem:[#allocation23_spill] sm:$0xff] }
 0x698   : > { %2108 = vmatprep.subr.mxu0 %v3885_v60  ;;  %2179 = vmatprep.subr.mxu1 %v3889_v8  ;;  %v4568_v60 = vld [vmem:[#allocation24_spill] sm:$0xff]  ;;  %v4569_v8 = vld [vmem:[#allocation25_spill] sm:$0xff] }
 0x699   : > { %2109 = vmatpush1.msra.mxu0 %v3893_v9  ;;  %2180 = vmatpush1.msra.mxu1 %v3897_v10  ;;  %v4570_v9 = vld [vmem:[#allocation26_spill] sm:$0xff]  ;;  %v4571_v10 = vld [vmem:[#allocation27_spill] sm:$0xff] }
 0x69a   : > { %2110 = vmatprep.subr.mxu0 %v3901_v11  ;;  %2181 = vmatprep.subr.mxu1 %v3905_v12  ;;  %v4572_v11 = vld [vmem:[#allocation28_spill] sm:$0xff]  ;;  %v4573_v12 = vld [vmem:[#allocation29_spill] sm:$0xff] }
 0x69b   : > { %2111 = vmatpush1.msra.mxu0 %v3909_v13  ;;  %2182 = vmatpush1.msra.mxu1 %v3913_v14  ;;  %v4574_v13 = vld [vmem:[#allocation30_spill] sm:$0xff]  ;;  %v4575_v14 = vld [vmem:[#allocation31_spill] sm:$0xff] }
 0x69c   : > { %2112 = vmatprep.subr.mxu0 %v3917_v15  ;;  %2183 = vmatprep.subr.mxu1 %v3921_v16  ;;  %v4576_v15 = vld [vmem:[#allocation32_spill] sm:$0xff]  ;;  %v4577_v16 = vld [vmem:[#allocation33_spill] sm:$0xff] }
 0x69d   : > { %2113 = vmatpush1.msra.mxu0 %v3925_v17  ;;  %2184 = vmatpush1.msra.mxu1 %v3929_v18  ;;  %v4578_v17 = vld [vmem:[#allocation34_spill] sm:$0xff]  ;;  %v4579_v18 = vld [vmem:[#allocation35_spill] sm:$0xff] }
 0x69e   : > { %2114 = vmatprep.subr.mxu0 %v3933_v19  ;;  %2185 = vmatprep.subr.mxu1 %v3937_v20  ;;  %v4580_v19 = vld [vmem:[#allocation36_spill] sm:$0xff]  ;;  %v4581_v20 = vmov 0.0  }
 0x69f   : > { %2115 = vmatpush1.msra.mxu0 %v3941_v21  ;;  %2186 = vmatpush1.msra.mxu1 %v3945_v22  ;;  %v4582_v21 = vld [vmem:[#allocation37_spill] sm:$0xff] }
 0x6a0   : > { %2116 = vmatprep.subr.mxu0 %v3949_v23  ;;  %2187 = vmatprep.subr.mxu1 %v3953_v25 }
 0x6a1   : > { %2117 = vmatpush1.msra.mxu0 %v3957_v28  ;;  %2188 = vmatpush1.msra.mxu1 %v3961_v29 }
 0x6a2   : > { %2118 = vmatprep.subr.mxu0 %v3965_v30  ;;  %2189 = vmatprep.subr.mxu1 %v3969_v31 }
 0x6a3   : > { %2119 = vmatpush1.msra.mxu0 %v3973_v32  ;;  %2190 = vmatpush1.msra.mxu1 %v3977_v33 }
 0x6a4   : > { %2120 = vmatprep.subr.mxu0 %v3981_v34  ;;  %2191 = vmatprep.subr.mxu1 %v3985_v35  ;;  %v1896_v35 = vld [vmem:[#allocation3 + $0x6] ss:$8 sm:$0xf] }
 0x6a5   : > { %2121 = vmatpush1.msra.mxu0 %v3989_v36  ;;  %2192 = vmatpush1.msra.mxu1 %v3993_v37 }
 0x6a6   : > { %2122 = vmatprep.subr.mxu0 %v3997_v38  ;;  %2193 = vmatprep.subr.mxu1 %v4001_v39 }
 0x6a7   : > { %2123 = vmatpush1.msra.mxu0 %v4005_v40  ;;  %2194 = vmatpush1.msra.mxu1 %v4009_v41 }
 0x6a8   : > { %2124 = vmatprep.subr.mxu0 %v4013_v42  ;;  %2195 = vmatprep.subr.mxu1 %v4017_v43 }
 0x6a9   : > { %2125 = vmatpush1.msra.mxu0 %v4021_v44  ;;  %2196 = vmatpush1.msra.mxu1 %v4025_v45 }
 0x6aa   : > { %2126 = vmatprep.subr.mxu0 %v4562_v62  ;;  %2197 = vmatprep.subr.mxu1 %v4563_v4 }
 0x6ab   : > { %2127 = vmatpush1.msra.mxu0 %v4564_v2  ;;  %2198 = vmatpush1.msra.mxu1 %v4565_v58 }
 0x6ac   : > { %2128 = vmatprep.subr.mxu0 %v4566_v6  ;;  %2199 = vmatprep.subr.mxu1 %v4567_v7  ;;  %v2103_v7 = vld [vmem:[#allocation3 + $0x7] ss:$8 sm:$0xf] }
 0x6ad   : > { %2129 = vmatpush1.msra.mxu0 %v4568_v60  ;;  %2200 = vmatpush1.msra.mxu1 %v4569_v8 }
 0x6ae   : > { %2130 = vmatprep.subr.mxu0 %v4570_v9  ;;  %2201 = vmatprep.subr.mxu1 %v4571_v10 }
 0x6af   : > { %2131 = vmatpush1.msra.mxu0 %v4572_v11  ;;  %2202 = vmatpush1.msra.mxu1 %v4573_v12 }
 0x6b0   : > { %2132 = vmatprep.subr.mxu0 %v4574_v13  ;;  %2203 = vmatprep.subr.mxu1 %v4575_v14 }
 0x6b1   : > { %2133 = vmatpush1.msra.mxu0 %v4576_v15  ;;  %2204 = vmatpush1.msra.mxu1 %v4577_v16 }
 0x6b2   : > { %2134 = vmatprep.subr.mxu0 %v4578_v17  ;;  %2205 = vmatprep.subr.mxu1 %v4579_v18 }
 0x6b3   : > { %2135 = vmatpush1.msra.mxu0 %v4580_v19  ;;  %2168 = vmatprep.mubr.f32.mxu0 %v4581_v20 }
 0x6b4   : > { %2206 = vmatpush1.msra.mxu1 %v4582_v21  ;;  %2239 = vmatprep.mubr.f32.mxu1 %v4581_v20 }
 0x754   : > { %v1963_v22 = vpop.f32.mrf.mxu0  ;;  %v2034_v23 = vpop.f32.mrf.mxu1 }
 0x756   : > { %v1965_v25 = vpop.f32.mrf.mxu0  ;;  %v2036_v28 = vpop.f32.mrf.mxu1 }
 0x757   : > { %v2043_v29 = vcombine.low %v1963_v22, %v1965_v25  ;;  %v2044_v30 = vcombine.low %v2034_v23, %v2036_v28 }
 0x759   : > { %v2051_v31 = vrot.slane %v2043_v29, %v3609_v63  ;;  %v2058_v32 = vrot.slane %v2044_v30, %v3609_v63 }
 0x75b   : > { %v2059_v33 = vcombine.low %v2051_v31, %v2058_v32 }
 0x75d   : > { %v2066_v34 = vrot.slane %v2059_v33, %v3609_v63 }
 0x75f   : > { %v2068_v36 = vadd.f32 %v2066_v34, %v1896_v35 }
 0x761   : > { %v2069_v37 = vmul.f32 0.5, %v2068_v36  ;;  %v2074_v38 = vrot.slane %v2068_v36, 1  ;;  %v2080_v40 = vrot.slane %v2068_v36, 2  ;;  %v2083_v41 = vrot.slane %v2068_v36, 3 }
 0x763   : > { %2681 = vtanh.f32 %v2069_v37  ;;  %v2076_v39 = vmul.f32 0.5, %v2074_v38  ;;  %v2085_v42 = vmul.f32 0.5, %v2083_v41 }
 0x765   : > { %2683 = vtanh.f32 %v2076_v39 }
 0x766   : > { %2685 = vtanh.f32 %v2080_v40 }
 0x767   : > { %2687 = vtanh.f32 %v2085_v42 }
 0x770   : > { %v2682_v43 = vpop.eup %2681 }
 0x771   : > { %v2071_v44 = vmul.f32 0.5, %v2682_v43 }
 0x772   : > { %v2684_v45 = vpop.eup %2683 }
 0x773   : > { %v2072_v61 = vadd.f32 0.5, %v2071_v44  ;;  %v2078_v52 = vmul.f32 0.5, %v2684_v45  ;;  %v2686_v1 = vpop.eup %2685 }
 0x774   : > { %v2688_v56 = vpop.eup %2687 }
 0x775   : > { %v2079_v24 = vadd.f32 0.5, %v2078_v52  ;;  %v2090_v27 = vmul.f32 %v2686_v1, %v2072_v61  ;;  %v2087_v54 = vmul.f32 0.5, %v2688_v56 }
 0x777   : > { %v2089_v26 = vmul.f32 %v2079_v24, %v4193_v57  ;;  %v2088_v47 = vadd.f32 0.5, %v2087_v54 }
 0x779   : > { %v2091_v48 = vadd.f32 %v2090_v27, %v2089_v26 }
 0x77b   : > { %2689 = vtanh.f32 %v2091_v48 }
 0x788   : > { %v2690_v3 = vpop.eup %2689 }
 0x789   : > { %v2093_v53 = vmul.f32 %v2690_v3, %v2088_v47 }
 0x78b   : > { %2169 = vmatmul.mubr.f32.vlgmr.msra.gmra.mxu0 %v2093_v53  ;;  %v2335_v0 = vrot.slane %v2093_v53, %v4495_v55  ;;  %2240 = vmatmul.mubr.f32.vlgmr.msra.gmra.mxu1 %v2093_v53 }
 0x78d   : > { %v2354_v5 = vsel %vm2353_vm5, %v4200_v59, %v2335_v0 }
 0x84b   : > { %v2170_v50 = vpop.f32.mrf.mxu0  ;;  %v2241_v51 = vpop.f32.mrf.mxu1 }
 0x84d   : > { %v2172_v46 = vpop.f32.mrf.mxu0  ;;  %v2243_v49 = vpop.f32.mrf.mxu1 }
 0x84e   : > { %v2250_v57 = vcombine.low %v2170_v50, %v2172_v46  ;;  %v2251_v62 = vcombine.low %v2241_v51, %v2243_v49 }
 0x850   : > { %v2258_v4 = vrot.slane %v2250_v57, %v3609_v63  ;;  %v2265_v2 = vrot.slane %v2251_v62, %v3609_v63 }
 0x852   : > { %v2266_v58 = vcombine.low %v2258_v4, %v2265_v2 }
 0x854   : > { %v2273_v6 = vrot.slane %v2266_v58, %v3609_v63 }
 0x856   : > { %v2275_v60 = vadd.f32 %v2273_v6, %v2103_v7 }
 0x858   : > { %v2276_v8 = vmul.f32 0.5, %v2275_v60  ;;  %v2281_v9 = vrot.slane %v2275_v60, 1  ;;  %v2287_v59 = vrot.slane %v2275_v60, 2  ;;  %v2290_v11 = vrot.slane %v2275_v60, 3 }
 0x85a   : > { %2691 = vtanh.f32 %v2276_v8  ;;  %v2283_v10 = vmul.f32 0.5, %v2281_v9  ;;  %v2292_v12 = vmul.f32 0.5, %v2290_v11 }
 0x85c   : > { %2693 = vtanh.f32 %v2283_v10 }
 0x85d   : > { %2695 = vtanh.f32 %v2287_v59 }
 0x85e   : > { %2697 = vtanh.f32 %v2292_v12 }
 0x867   : > { %v2692_v13 = vpop.eup %2691 }
 0x868   : > { %v2278_v14 = vmul.f32 0.5, %v2692_v13 }
 0x869   : > { %v2694_v15 = vpop.eup %2693 }
 0x86a   : > { %v2279_v16 = vadd.f32 0.5, %v2278_v14  ;;  %v2285_v17 = vmul.f32 0.5, %v2694_v15  ;;  %v2696_v19 = vpop.eup %2695 }
 0x86b   : > { %v2698_v22 = vpop.eup %2697 }
 0x86c   : > { %v2286_v18 = vadd.f32 0.5, %v2285_v17  ;;  %v2297_v20 = vmul.f32 %v2696_v19, %v2279_v16  ;;  %v2294_v23 = vmul.f32 0.5, %v2698_v22 }
 0x86e   : > { %v2296_v63 = vmul.f32 %v2286_v18, %v2091_v48  ;;  %v2295_v25 = vadd.f32 0.5, %v2294_v23 }
 0x870   : > { %v2298_v21 = vadd.f32 %v2297_v20, %v2296_v63 }
 0x872   : > { %2699 = vtanh.f32 %v2298_v21 }
 0x87f   : > { %v2700_v28 = vpop.eup %2699 }
 0x880   : > { %v2300_v29 = vmul.f32 %v2700_v28, %v2295_v25 }
 0x881   : > { %2361 = sbr.rel (%p2539_p8) target bundleno = 2456 (0x998), region = 68 }
 0x882   : > { %v2341_v30 = vrot.slane %v2300_v29, %v4495_v55 }
 0x884   : > { %v2356_v31 = vsel %vm2355_vm6, %v2354_v5, %v2341_v30 }
 0x885   : > { %2357 = vst [vmem:[#allocation2] sm:$0xff] %v2356_v31 }
 0x886   : > { %v2540_v33 = vld [vmem:[%s4307_s4] ss:$0 sm:$0xff]  ;;  %v2956_v35 = vmov 0   ;;  %v2541_v36 = vld [vmem:[#allocation4] ss:$0 sm:$0xff] }
 0x887   : > { %2765 = vset.pattern.permute.xlu0 %v2956_v35 }
 0x88c   : > { %v2362_v32 = vld [vmem:[#allocation2] sm:$0xff] }
 0x88d   : > { %v2370_v34 = vmul.f32 %v2540_v33, %v2362_v32 }
 0x88f   : > { %2371 = vadd.xlane.f32.xlu0 %v2370_v34 }
 0x918   : > { %v2372_v37 = vpop.xlane.xlu0 %2371 }
 0x919   : > { %v2380_v38 = vadd.f32 %v2541_v36, %v2372_v37 }
 0x91b   : > { %2383 = vperm.xlu0 %2765, %v2380_v38  }
 0x996   : > { %v2384_v39 = vpop.permute.xlu0 %2383 }
 0x997   : > { %2386 = vst [vmem:[#allocation13] sm:$0xff] %v2384_v39 }
 0x998 PF: > { %p2580_p9 = scmp.eq.s32.totalorder %s3094_s28, 1  ;;  %s2957_s27 = smov [#allocation13]  }
 0x999   : > { %s2394_s30 = sshll.u32 %s2957_s27, 4  ;;  %s2395_s30 = int_to_ptr.vmem [resolvable:$true] %s2394_s30 }
 0x99a   : > { %s2876_s23 = scalar_lea.vmem %s2395_s30, 128  ;;  %p2883_p3 = scmp.lt.s32.totalorder %s2395_s30, %s2395_s30 }
 0x99b   : > { %p2877_p11 = scmp.ne.s32.totalorder %s2395_s30, %s2876_s23  ;;  %p2884_p4 = scmp.lt.s32.totalorder %s2876_s23, %s2876_s23 }
 0x99d   : > { %p2878_p1 = pnand %p2877_p11, %p2580_p9  ;;  %p2885_p13 = por %p2884_p4, %p2883_p3 }
 0x99f   : > { %p2879_p12 = pneg %p2878_p1 }
 0x9a1   : > { %p2886_p0 = pnand %p2885_p13, %p2879_p12 }
 0x9a3   : > { %2889 = shalt.err (!%p2886_p0)
}
 0x9a4   : > { %2560 = dma.vmem_to_hbm [thread:$0]  (%p2580_p9), %s2395_s30, 128, %s4309_s6, [#allocation7]  }
 0x9a5   : > { %2929 = dma.done.wait (%p2580_p9), [#allocation7], 128  }
 0x9a6   : > { %2931 = vsyncadd (%p2580_p9), [#allocation7], 4294967168 }
 0x9a7 PF: > { %p23_p2 = scmp.ge.s32.totalorder %s3017_s5, 4   ;;  %s4583_s23 = smov %s2938_s24 }
 0x9a8   : > { %s4584_s24 = smov %s2942_s25  ;;  %s4585_s25 = smov %s3027_s29 }
 0x9a9   : > { %s4586_s26 = smov %s3017_s5  ;;  %25 = sbr.rel (!%p23_p2) target bundleno = 10 (0xa), region = 126 }
 0x9ae   :  { %2407 = vsyncpa [#allocation6], 1 }
 0x9af   :  { %2409 = vsyncpa [#allocation6 + $0x1], 1 }
 0x9b0   :  { %2410 = vsyncpa [#allocation9], 1 }
 0x9b1   :  { %2412 = vsyncpa [#allocation9 + $0x1], 1 }
 0x9b2   :  { %2413 = vsyncpa [#allocation12], 1 }
 0x9b3   :  { %2415 = vsyncpa [#allocation12 + $0x1], 1 }
 0x9b4   :  { %2416 = vsyncpa [#allocation7], 1 }
 0x9b5   :  { %2418 = vsyncpa [#allocation7 + $0x1], 1 }

</bundles_post_ra>
